<compile_context>
chip_gen: v7x
topology: tpu7x:2x2x1
jax: 0.10.0
libtpu: 0.0.40
codegen_flags: <defaults>
</compile_context>

<pallas_src>
import math

import jax
import jax.numpy as jnp
from jax.experimental import pallas as pl
from jax.experimental.pallas import tpu as pltpu

_LOG_CLAMP = math.log(1e-7)
_MM_PRECISION = jax.lax.Precision.HIGHEST


def _round_up(x, m):
    return ((x + m - 1) // m) * m


def matching_kernel(scale_ref, ftest_ref, ftrain_ref, labels_ref, out_ref):
    # ftest_ref : (Bb, Nt,  Cp)   ftrain_ref: (Bb, Ntr, Cp)
    # labels_ref: (Bb, Ntr, Kp)   out_ref   : (Bb, Nt,  Kp)
    # scale_ref : (1,) scalar in SMEM
    ft = ftest_ref[...]
    fr = ftrain_ref[...]
    lb = labels_ref[...]
    scale = scale_ref[0]

    eps = jnp.float32(1e-12)
    # F.normalize(x, p=2, dim=-1, eps=1e-12) == x / max(||x||_2, eps).
    # Compute the per-row inverse norm (only N x 1 divides) and apply it with a
    # multiply over the full N x C tile; fold scale_cls into the test operand.
    ft_inv = 1.0 / jnp.maximum(
        jnp.sqrt(jnp.sum(ft * ft, axis=-1, keepdims=True)), eps)
    fr_inv = 1.0 / jnp.maximum(
        jnp.sqrt(jnp.sum(fr * fr, axis=-1, keepdims=True)), eps)
    ft_n = ft * (ft_inv * scale)
    fr_n = fr * fr_inv

    # Scaled cosine similarities (Bb, Nt, Ntr): contract last (channel) dims of
    # both operands directly -- no explicit transpose is materialized.
    sim = jnp.einsum("btc,brc->btr", ft_n, fr_n,
                     preferred_element_type=jnp.float32,
                     precision=_MM_PRECISION)

    # Numerically stable softmax over train examples; the normalization by
    # sum_e is folded into the log epilogue (log is monotone, so the clamp
    # commutes with it).
    m = jnp.max(sim, axis=-1, keepdims=True)
    e = jnp.exp(sim - m)
    sum_e = jnp.sum(e, axis=-1, keepdims=True)            # (Bb, Nt, 1)

    unnorm = jnp.einsum("btr,brk->btk", e, lb,
                        preferred_element_type=jnp.float32,
                        precision=_MM_PRECISION)           # (Bb, Nt, Kp)

    out_ref[...] = jnp.maximum(jnp.log(unnorm) - jnp.log(sum_e),
                               jnp.float32(_LOG_CLAMP))


def matching_network(scale_cls, features_test, features_train, labels_train,
                     *, batch_block=None):
    B, Nt, C = features_test.shape
    _, Ntr, K = labels_train.shape

    LANE = 128
    Cp = _round_up(C, LANE)
    Kp = _round_up(K, LANE)

    # Lane-dense padding of the contraction (C) and class (K) dims: zeros do
    # not change norms, dot products, or the clamped-log result.
    if Cp != C:
        pad_c = ((0, 0), (0, 0), (0, Cp - C))
        features_test = jnp.pad(features_test, pad_c)
        features_train = jnp.pad(features_train, pad_c)
    if Kp != K:
        labels_train = jnp.pad(labels_train, ((0, 0), (0, 0), (0, Kp - K)))

    if batch_block is None:
        # Amortize per-grid-step overhead (several episodes per step) while
        # keeping at least two "parallel" steps for the two v7x TensorCores.
        batch_block = max(1, min(8, pl.cdiv(B, 2)))
    Bp = _round_up(B, batch_block)
    if Bp != B:
        pad_b = ((0, Bp - B), (0, 0), (0, 0))
        features_test = jnp.pad(features_test, pad_b)
        features_train = jnp.pad(features_train, pad_b)
        labels_train = jnp.pad(labels_train, pad_b)

    scale_cls = scale_cls.astype(jnp.float32).reshape((1,))

    out = pl.pallas_call(
        matching_kernel,
        out_shape=jax.ShapeDtypeStruct((Bp, Nt, Kp), jnp.float32),
        grid=(Bp // batch_block,),
        in_specs=[
            pl.BlockSpec(memory_space=pltpu.MemorySpace.SMEM),      # scale (1,)
            pl.BlockSpec((batch_block, Nt, Cp), lambda b: (b, 0, 0)),
            pl.BlockSpec((batch_block, Ntr, Cp), lambda b: (b, 0, 0)),
            pl.BlockSpec((batch_block, Ntr, Kp), lambda b: (b, 0, 0)),
        ],
        out_specs=pl.BlockSpec((batch_block, Nt, Kp), lambda b: (b, 0, 0)),
        compiler_params=pltpu.CompilerParams(
            dimension_semantics=("parallel",)),
    )(scale_cls, features_test, features_train, labels_train)

    return out[:B, :, :K]


def matching_network_ref(scale_cls, features_test, features_train, labels_train):
    """Pure-JAX reference mirroring the PyTorch forward exactly."""
    eps = 1e-12
    ft = features_test / jnp.maximum(
        jnp.linalg.norm(features_test, axis=-1, keepdims=True), eps)
    fr = features_train / jnp.maximum(
        jnp.linalg.norm(features_train, axis=-1, keepdims=True), eps)
    sim = scale_cls[0] * jnp.einsum("btc,brc->btr", ft, fr,
                                    precision=_MM_PRECISION)
    p = jax.nn.softmax(sim, axis=-1)
    scores = jnp.einsum("btr,brk->btk", p, labels_train,
                        precision=_MM_PRECISION)
    return jnp.log(jnp.maximum(scores, 1e-7))


if __name__ == "__main__":
    key = jax.random.PRNGKey(0)
    # batch, test examples, train examples, channels, novel classes
    B, Nt, Ntr, C, K = 8, 16, 16, 32, 5

    k1, k2, k3 = jax.random.split(key, 3)
    features_test = jax.random.normal(k1, (B, Nt, C), dtype=jnp.float32)
    features_train = jax.random.normal(k2, (B, Ntr, C), dtype=jnp.float32)
    label_ids = jax.random.randint(k3, (B, Ntr), 0, K)
    labels_train = jax.nn.one_hot(label_ids, K, dtype=jnp.float32)

    # deterministic parameter init, as in the module __init__ (fill_(10.0))
    scale_cls = jnp.full((1,), 10.0, dtype=jnp.float32)

    out = matching_network(scale_cls, features_test, features_train, labels_train)
    out = jax.block_until_ready(out)

    ref = matching_network_ref(scale_cls, features_test, features_train, labels_train)
    assert out.shape == (B, Nt, K)
    max_err = jnp.max(jnp.abs(out - ref))
    assert jnp.allclose(out, ref, atol=1e-4, rtol=1e-4), f"mismatch vs reference: {max_err}"

    print("KERNEL_OK")
</pallas_src>

<mosaic_0001>
module attributes {stable_mosaic.version = 11 : i64} {
  func.func @matching_kernel(%arg0: i32, %arg1: memref<1xf32, #tpu.memory_space<smem>>, %arg2: memref<4x16x128xf32, #tpu.memory_space<vmem>>, %arg3: memref<4x16x128xf32, #tpu.memory_space<vmem>>, %arg4: memref<4x16x128xf32, #tpu.memory_space<vmem>>, %arg5: memref<4x16x128xf32, #tpu.memory_space<vmem>>) attributes {dimension_semantics = [#tpu.dimension_semantics<parallel>], iteration_bounds = array<i64: 2>, scalar_prefetch = 0 : i64, scratch_operands = 0 : i64, tpu.core_type = #tpu.core_type<tc>, window_params = [{transform_indices = @transform_0, window_bounds = array<i64: 1>}, {transform_indices = @transform_1, window_bounds = array<i64: 4, 16, 128>}, {transform_indices = @transform_2, window_bounds = array<i64: 4, 16, 128>}, {transform_indices = @transform_3, window_bounds = array<i64: 4, 16, 128>}, {transform_indices = @transform_4, window_bounds = array<i64: 4, 16, 128>}]} {
    %c0 = arith.constant 0 : index
    %c0_0 = arith.constant 0 : index
    %c0_1 = arith.constant 0 : index
    %0 = vector.load %arg2[%c0, %c0_0, %c0_1] : memref<4x16x128xf32, #tpu.memory_space<vmem>>, vector<4x16x128xf32>
    %c0_2 = arith.constant 0 : index
    %c0_3 = arith.constant 0 : index
    %c0_4 = arith.constant 0 : index
    %1 = vector.load %arg3[%c0_2, %c0_3, %c0_4] : memref<4x16x128xf32, #tpu.memory_space<vmem>>, vector<4x16x128xf32>
    %c0_5 = arith.constant 0 : index
    %c0_6 = arith.constant 0 : index
    %c0_7 = arith.constant 0 : index
    %2 = vector.load %arg4[%c0_5, %c0_6, %c0_7] : memref<4x16x128xf32, #tpu.memory_space<vmem>>, vector<4x16x128xf32>
    %c0_8 = arith.constant 0 : index
    %3 = memref.load %arg1[%c0_8] : memref<1xf32, #tpu.memory_space<smem>>
    %4 = arith.mulf %0, %0 : vector<4x16x128xf32>
    %cst = arith.constant dense<0.000000e+00> : vector<4x16xf32>
    %5 = vector.multi_reduction <add>, %4, %cst [2] : vector<4x16x128xf32> to vector<4x16xf32>
    %6 = vector.shape_cast %5 : vector<4x16xf32> to vector<4x16x1xf32>
    %7 = math.sqrt %6 : vector<4x16x1xf32>
    %cst_9 = arith.constant 9.99999996E-13 : f32
    %8 = vector.broadcast %cst_9 : f32 to vector<4x16x1xf32>
    %9 = arith.maximumf %7, %8 : vector<4x16x1xf32>
    %cst_10 = arith.constant 1.000000e+00 : f32
    %10 = vector.broadcast %cst_10 : f32 to vector<4x16x1xf32>
    %11 = arith.divf %10, %9 : vector<4x16x1xf32>
    %12 = arith.mulf %1, %1 : vector<4x16x128xf32>
    %cst_11 = arith.constant dense<0.000000e+00> : vector<4x16xf32>
    %13 = vector.multi_reduction <add>, %12, %cst_11 [2] : vector<4x16x128xf32> to vector<4x16xf32>
    %14 = vector.shape_cast %13 : vector<4x16xf32> to vector<4x16x1xf32>
    %15 = math.sqrt %14 : vector<4x16x1xf32>
    %cst_12 = arith.constant 9.99999996E-13 : f32
    %16 = vector.broadcast %cst_12 : f32 to vector<4x16x1xf32>
    %17 = arith.maximumf %15, %16 : vector<4x16x1xf32>
    %cst_13 = arith.constant 1.000000e+00 : f32
    %18 = vector.broadcast %cst_13 : f32 to vector<4x16x1xf32>
    %19 = arith.divf %18, %17 : vector<4x16x1xf32>
    %20 = vector.broadcast %3 : f32 to vector<4x16x1xf32>
    %21 = arith.mulf %11, %20 : vector<4x16x1xf32>
    %22 = vector.broadcast %21 : vector<4x16x1xf32> to vector<4x16x128xf32>
    %23 = arith.mulf %0, %22 : vector<4x16x128xf32>
    %24 = vector.broadcast %19 : vector<4x16x1xf32> to vector<4x16x128xf32>
    %25 = arith.mulf %1, %24 : vector<4x16x128xf32>
    "tpu.trace_start"() <{level = 10 : i32, message = "btc,brc->btr"}> : () -> ()
    %cst_14 = arith.constant dense<0.000000e+00> : vector<4x16x16xf32>
    %26 = tpu.matmul %23, %25, %cst_14 {dimension_numbers = #tpu.dot_dimension_numbers<[2], [2], [1], [1], [0, 0, 0, 1, 1, 1], [0], [0]>, precision = #tpu.contract_precision<fp32>} : vector<4x16x128xf32>, vector<4x16x128xf32>, vector<4x16x16xf32> -> vector<4x16x16xf32>
    "tpu.trace_stop"() : () -> ()
    %cst_15 = arith.constant dense<0xFF800000> : vector<4x16xf32>
    %27 = vector.multi_reduction <maximumf>, %26, %cst_15 [2] : vector<4x16x16xf32> to vector<4x16xf32>
    %28 = vector.shape_cast %27 : vector<4x16xf32> to vector<4x16x1xf32>
    %29 = vector.broadcast %28 : vector<4x16x1xf32> to vector<4x16x16xf32>
    %30 = arith.subf %26, %29 : vector<4x16x16xf32>
    %31 = math.exp %30 : vector<4x16x16xf32>
    %cst_16 = arith.constant dense<0.000000e+00> : vector<4x16xf32>
    %32 = vector.multi_reduction <add>, %31, %cst_16 [2] : vector<4x16x16xf32> to vector<4x16xf32>
    %33 = vector.shape_cast %32 : vector<4x16xf32> to vector<4x16x1xf32>
    "tpu.trace_start"() <{level = 10 : i32, message = "btr,brk->btk"}> : () -> ()
    %cst_17 = arith.constant dense<0.000000e+00> : vector<4x16x128xf32>
    %34 = tpu.matmul %31, %2, %cst_17 {dimension_numbers = #tpu.dot_dimension_numbers<[2], [1], [1], [2], [0, 0, 0, 1, 1, 2], [0], [0]>, precision = #tpu.contract_precision<fp32>} : vector<4x16x16xf32>, vector<4x16x128xf32>, vector<4x16x128xf32> -> vector<4x16x128xf32>
    "tpu.trace_stop"() : () -> ()
    %35 = math.log %34 : vector<4x16x128xf32>
    %36 = math.log %33 : vector<4x16x1xf32>
    %37 = vector.broadcast %36 : vector<4x16x1xf32> to vector<4x16x128xf32>
    %38 = arith.subf %35, %37 : vector<4x16x128xf32>
    %cst_18 = arith.constant -16.1180954 : f32
    %39 = vector.broadcast %cst_18 : f32 to vector<4x16x128xf32>
    %40 = arith.maximumf %38, %39 : vector<4x16x128xf32>
    %c0_19 = arith.constant 0 : index
    %c0_20 = arith.constant 0 : index
    %c0_21 = arith.constant 0 : index
    %41 = vector.load %arg5[%c0_19, %c0_20, %c0_21] : memref<4x16x128xf32, #tpu.memory_space<vmem>>, vector<4x16x128xf32>
    tpu.vector_store %arg5[%c0_19, %c0_20, %c0_21], %40 {strides = array<i32>} : memref<4x16x128xf32, #tpu.memory_space<vmem>>, vector<4x16x128xf32>,
    return
  }
  func.func @transform_0(%arg0: i32) -> i32 {
    %c0_i32 = arith.constant 0 : i32
    %c0_i32_0 = arith.constant 0 : i32
    return %c0_i32 : i32
  }
  func.func @transform_1(%arg0: i32) -> (i32, i32, i32) {
    %c0_i32 = arith.constant 0 : i32
    %c0_i32_0 = arith.constant 0 : i32
    %c0_i32_1 = arith.constant 0 : i32
    return %arg0, %c0_i32, %c0_i32_0 : i32, i32, i32
  }
  func.func @transform_2(%arg0: i32) -> (i32, i32, i32) {
    %c0_i32 = arith.constant 0 : i32
    %c0_i32_0 = arith.constant 0 : i32
    %c0_i32_1 = arith.constant 0 : i32
    return %arg0, %c0_i32, %c0_i32_0 : i32, i32, i32
  }
  func.func @transform_3(%arg0: i32) -> (i32, i32, i32) {
    %c0_i32 = arith.constant 0 : i32
    %c0_i32_0 = arith.constant 0 : i32
    %c0_i32_1 = arith.constant 0 : i32
    return %arg0, %c0_i32, %c0_i32_0 : i32, i32, i32
  }
  func.func @transform_4(%arg0: i32) -> (i32, i32, i32) {
    %c0_i32 = arith.constant 0 : i32
    %c0_i32_0 = arith.constant 0 : i32
    %c0_i32_1 = arith.constant 0 : i32
    return %arg0, %c0_i32, %c0_i32_0 : i32, i32, i32
  }
}

</mosaic_0001>

<bundles_post_ra>
// kernel: tpu_custom_call.1
= control target key start
LH: loop header
LB: loop body
LE: loop exit
PB: predicated region body
PF: predicated region fallthrough
CT: control target
= control target key end

     0   :  { %s6984_s0 = inlined_call_operand.<no memory space> [shape: f32[1], index: 0, kind: input, shape index: {}]   ;;  %s6985_s1 = inlined_call_operand.hbm [shape: f32[8,16,128], index: 1, kind: input, shape index: {}]   ;;  %s6986_s2 = inlined_call_operand.hbm [shape: f32[8,16,128], index: 2, kind: input, shape index: {}]   ;;  %s6987_s3 = inlined_call_operand.hbm [shape: f32[8,16,128], index: 3, kind: input, shape index: {}]   ;;  %s6988_s4 = inlined_call_operand.hbm [shape: f32[8,16,128], index: 4, kind: output, shape index: {}]  }
   0x1   :  { %6995 = sst [smem:[#allocation13_spill]] %s6985_s1 }
   0x2   :  { %9 = sst [smem:[#allocation2]] %s6984_s0 }
   0x3   :  { %10 = vsyncpa [#allocation4], 0 }
   0x4   :  { %12 = vsyncpa [#allocation4 + $0x1], 0 }
   0x5   :  { %13 = vsyncpa [#allocation7], 0 }
   0x6   :  { %15 = vsyncpa [#allocation7 + $0x1], 0 }
   0x7   :  { %16 = vsyncpa [#allocation5], 0 }
   0x8   :  { %18 = vsyncpa [#allocation5 + $0x1], 0  ;;  %s6063_s17 = smov 0   ;;  %s6065_s18 = smov 0  }
   0x9   :  { %s6067_s19 = smov 0   ;;  %s6069_s20 = smov 0  }
   0xa LB: > { %s6084_s0 = sadd.s32 4294967295, %s6025_s20   ;;  %s4859_s21 = sadd.s32 4294967294, %s6025_s20   ;;  %s6025_s20 = sphi %s6069_s20, %s7014_s20   ;;  %s6021_s19 = sphi %s6067_s19, %s7013_s19   ;;  %s6017_s18 = sphi %s6065_s18, %s7012_s18   ;;  %s6013_s17 = sphi %s6063_s17, %s7011_s17  }
   0xb   : > { %s6088_s22 = sadd.s32 1, %s6025_s20   ;;  %s52_s23 = sadd.s32 1, %s6021_s19 }
   0xc   : > { %s49_s24 = ssub.s32 %s6025_s20, %s6088_s22  ;;  %p59_p0 = scmp.ne.s32.totalorder %s6021_s19, %s6017_s18 }
   0xd   : > { %p50_p1 = scmp.eq.s32.totalorder %s49_s24, 0  ;;  %p60_p2 = scmp.eq.s32.totalorder %s6025_s20, 0 }
   0xe   : > { %p65_p3 = scmp.ne.s32.totalorder %s6017_s18, %s6013_s17  ;;  %p66_p4 = scmp.eq.s32.totalorder %s6084_s0, 0 }
   0xf   : > { %s6100_s25 = scalar_select %p50_p1, %s6021_s19, %s52_s23  }
  0x10   : > { %p61_p5 = por %p60_p2, %p59_p0  ;;  %p6102_p6 = por %p66_p4, %p65_p3 }
  0x11   : > { %p141_p7 = scmp.eq.s32.totalorder %s6084_s0, 1  ;;  %p147_p8 = scmp.eq.s32.totalorder %s4859_s21, 1 }
  0x12   : > { %s6996_s26 = scalar_select %p6102_p6, 1, 0 }
  0x13   : > { %p5715_p10 = scmp.lt.s32.totalorder %s6025_s20, 2  ;;  %p6109_p11 = por %p141_p7, %p59_p0 }
  0x14   : > { %p6113_p12 = por %p147_p8, %p65_p3  ;;  %s170_s29 = sand.u32 1, %s6021_s19  }
  0x15   : > { %s6997_s27 = scalar_select %p6109_p11, 1, 0 }
  0x16   : > { %s6998_s28 = scalar_select %p6113_p12, 1, 0 }
  0x17   : > { %s6119_s30 = sshll.u32 %s6025_s20, 10  ;;  %s6123_s5 = sshll.u32 %s170_s29, 6 }
  0x18   : > { %p6125_p13 = pnand %p5715_p10, %p61_p5  ;;  %s192_s7 = sand.u32 1, %s6025_s20  }
  0x19   : > { %s6134_s10 = scalar_lea.hbm %s6986_s2, %s6119_s30  ;;  %s196_s11 = scalar_lea.vmem [#allocation6], %s6123_s5 }
  0x1a   : > { %s204_s12 = sshll.u32 %s196_s11, 4  ;;  %s6140_s13 = scalar_lea.sflag [#allocation7], %s192_s7  ;;  %s6137_s12 = int_to_ptr.vmem [resolvable:$true] %s204_s12 }
  0x1b   : > { %s5865_s14 = scalar_lea.hbm %s6134_s10, 1024  ;;  %p6146_p2 = pneg %p6125_p13 }
  0x1c   : > { %p5866_p1 = scmp.ne.s32.totalorder %s6134_s10, %s5865_s14  ;;  %s5870_s23 = scalar_lea.hbm %s6986_s2, 2048 }
  0x1d   : > { %p5871_p5 = scmp.lt.u32.totalorder %s6134_s10, %s6986_s2  ;;  %p5872_p7 = scmp.lt.u32.totalorder %s5870_s23, %s5865_s14 }
  0x1e   : > { %p5868_p3 = pnand %p6146_p2, %p5866_p1  ;;  %p5874_p10 = scmp.lt.u32.totalorder %s5865_s14, %s6134_s10 }
  0x1f   : > { %p5873_p8 = por %p5872_p7, %p5871_p5 }
  0x20   : > { %p5869_p4 = pneg %p5868_p3 }
  0x21   : > { %p5875_p9 = por %p5874_p10, %p5873_p8 }
  0x23   : > { %p5876_p0 = pnand %p5875_p9, %p5869_p4 }
  0x25   : > { %5879 = shalt.err (!%p5876_p0)
}
  0x26   : > { %s5880_s7 = scalar_lea.vmem %s6137_s12, 1024  ;;  %s6027_s9 = smov [#allocation6]  }
  0x27   : > { %p5881_p1 = scmp.ne.s32.totalorder %s6137_s12, %s5880_s7  ;;  %s5885_s11 = sshll.u32 %s6027_s9, 4  ;;  %s5886_s11 = int_to_ptr.vmem [resolvable:$false] %s5885_s11 }
  0x28   : > { %s5887_s16 = scalar_lea.vmem %s5886_s11, 2048  ;;  %p5888_p11 = scmp.lt.s32.totalorder %s6137_s12, %s5886_s11 }
  0x29   : > { %p5883_p3 = pnand %p5881_p1, %p6146_p2  ;;  %p5889_p6 = scmp.lt.s32.totalorder %s5887_s16, %s5880_s7 }
  0x2b   : > { %p5884_p12 = pneg %p5883_p3  ;;  %p5890_p5 = por %p5889_p6, %p5888_p11 }
  0x2d   : > { %p5891_p7 = pnand %p5890_p5, %p5884_p12 }
  0x2f   : > { %5894 = shalt.err (!%p5891_p7)
}
  0x30   : > { %s6991_s14 = smov 128   ;;  %s6993_s21 = smov 8  }
  0x31   : > { %5707 = dma.hbm_to_vmem [thread:$0]  (!%p6125_p13), %s6134_s10, 1024, %s6137_s12, %s6140_s13, %s6991_s14, %s6991_s14, %s6993_s21  }
  0x32   : > { %p234_p6 = scmp.lt.s32.totalorder %s6025_s20, 3  ;;  %s7001_s1 = sld [smem:[#allocation13_spill]] }
  0x33   : > { %p7002_p9 = scmp.ge.s32.totalorder %s6025_s20, 1  ;;  %s174_s9 = scalar_lea.vmem [#allocation3], %s6123_s5 }
  0x34   : > { %s182_s11 = sshll.u32 %s174_s9, 4  ;;  %s6191_s10 = scalar_lea.sflag [#allocation4], %s170_s29  ;;  %s6187_s11 = int_to_ptr.vmem [resolvable:$true] %s182_s11 }
  0x35   : > { %p6182_p11 = pnand %p7002_p9, %p234_p6 }
  0x37   : > { %s7003_s7 = scalar_select %p6182_p11, 1, 0 }
  0x38   : > { %s6178_s8 = scalar_lea.hbm %s7001_s1, %s6119_s30  ;;  %s5900_s24 = scalar_lea.hbm %s7001_s1, 2048 }
  0x39   : > { %s5895_s12 = scalar_lea.hbm %s6178_s8, 1024  ;;  %p5901_p8 = scmp.lt.u32.totalorder %s6178_s8, %s7001_s1 }
  0x3a   : > { %p5896_p12 = scmp.ne.s32.totalorder %s6178_s8, %s5895_s12  ;;  %p5902_p10 = scmp.lt.u32.totalorder %s5900_s24, %s5895_s12 }
  0x3b   : > { %p5904_p3 = scmp.lt.u32.totalorder %s5895_s12, %s6178_s8 }
  0x3c   : > { %p5898_p0 = pnand %p5896_p12, %p6146_p2  ;;  %p5903_p1 = por %p5902_p10, %p5901_p8 }
  0x3e   : > { %p5899_p4 = pneg %p5898_p0  ;;  %p5905_p5 = por %p5904_p3, %p5903_p1 }
  0x40   : > { %p5906_p7 = pnand %p5905_p5, %p5899_p4 }
  0x42   : > { %5909 = shalt.err (!%p5906_p7)
}
  0x43   : > { %s5910_s29 = scalar_lea.vmem %s6187_s11, 1024  ;;  %s6030_s9 = smov [#allocation3]  }
  0x44   : > { %p5911_p6 = scmp.ne.s32.totalorder %s6187_s11, %s5910_s29  ;;  %s5915_s16 = sshll.u32 %s6030_s9, 4  ;;  %s5916_s16 = int_to_ptr.vmem [resolvable:$false] %s5915_s16 }
  0x45   : > { %s5917_s14 = scalar_lea.vmem %s5916_s16, 2048  ;;  %p5918_p0 = scmp.lt.s32.totalorder %s6187_s11, %s5916_s16 }
  0x46   : > { %p5913_p9 = pnand %p5911_p6, %p6146_p2  ;;  %p5919_p11 = scmp.lt.s32.totalorder %s5917_s14, %s5910_s29 }
  0x48   : > { %p5914_p12 = pneg %p5913_p9  ;;  %p5920_p8 = por %p5919_p11, %p5918_p0 }
  0x4a   : > { %p5921_p10 = pnand %p5920_p8, %p5914_p12 }
  0x4c   : > { %5924 = shalt.err (!%p5921_p10)
}
  0x4d   : > { %s7004_s21 = smov 8   ;;  %s7005_s12 = smov 128  }
  0x4e   : > { %5704 = dma.hbm_to_vmem [thread:$0]  (!%p6125_p13), %s6178_s8, 1024, %s6187_s11, %s6191_s10, %s7005_s12, %s7005_s12, %s7004_s21  }
  0x4f   : > { %s6222_s9 = scalar_lea.hbm %s6987_s3, %s6119_s30  ;;  %s218_s29 = scalar_lea.vmem [#allocation8], %s6123_s5 }
  0x50   : > { %s226_s16 = sshll.u32 %s218_s29, 4  ;;  %s5925_s14 = scalar_lea.hbm %s6222_s9, 1024  ;;  %s6225_s16 = int_to_ptr.vmem [resolvable:$true] %s226_s16 }
  0x51   : > { %p5926_p11 = scmp.ne.s32.totalorder %s6222_s9, %s5925_s14  ;;  %s5930_s11 = scalar_lea.hbm %s6987_s3, 2048 }
  0x52   : > { %p5931_p3 = scmp.lt.u32.totalorder %s6222_s9, %s6987_s3  ;;  %p5932_p5 = scmp.lt.u32.totalorder %s5930_s11, %s5925_s14 }
  0x53   : > { %p5928_p4 = pnand %p5926_p11, %p6146_p2  ;;  %p5934_p6 = scmp.lt.u32.totalorder %s5925_s14, %s6222_s9 }
  0x54   : > { %p5933_p7 = por %p5932_p5, %p5931_p3 }
  0x55   : > { %p5929_p1 = pneg %p5928_p4 }
  0x56   : > { %p5935_p9 = por %p5934_p6, %p5933_p7 }
  0x58   : > { %p5936_p12 = pnand %p5935_p9, %p5929_p1 }
  0x5a   : > { %5939 = shalt.err (!%p5936_p12)
}
  0x5b   : > { %s5940_s5 = scalar_lea.vmem %s6225_s16, 1024  ;;  %s6031_s1 = smov [#allocation8]  }
  0x5c   : > { %p5941_p0 = scmp.ne.s32.totalorder %s6225_s16, %s5940_s5  ;;  %s5945_s23 = sshll.u32 %s6031_s1, 4  ;;  %s5946_s23 = int_to_ptr.vmem [resolvable:$false] %s5945_s23 }
  0x5d   : > { %s5947_s24 = scalar_lea.vmem %s5946_s23, 2048  ;;  %p5948_p11 = scmp.lt.s32.totalorder %s6225_s16, %s5946_s23 }
  0x5e   : > { %p5943_p8 = pnand %p5941_p0, %p6146_p2  ;;  %p5949_p4 = scmp.lt.s32.totalorder %s5947_s24, %s5940_s5 }
  0x60   : > { %p5944_p10 = pneg %p5943_p8  ;;  %p5950_p3 = por %p5949_p4, %p5948_p11 }
  0x62   : > { %p5951_p5 = pnand %p5950_p3, %p5944_p10 }
  0x64   : > { %5954 = shalt.err (!%p5951_p5)
}
  0x65   : > { %5710 = dma.hbm_to_vmem [thread:$0]  (!%p6125_p13), %s6222_s9, 1024, %s6225_s16, %s6140_s13, %s7005_s12, %s7005_s12, %s7004_s21  }
  0x66   : > { %p7006_p2 = scmp.ne.s32.totalorder %s7003_s7, 0 }
  0x67   : > { %s6255_s15 = sand.u32 (!%p7006_p2), 1, %s6017_s18   ;;  %p7007_p1 = scmp.ne.s32.totalorder (!%p7006_p2), %s6996_s26, 0 }
  0x68   : > { %238 = sbr.rel (%p7006_p2) target bundleno = 1079 (0x437), region = 36  ;;  %s6258_s29 = sshll.u32 (!%p7006_p2), %s6255_s15, 6 }
  0x69   : > { %s241_s6 = scalar_lea.sflag (!%p7006_p2), [#allocation4], %s6255_s15  ;;  %s6262_s14 = scalar_lea.vmem (!%p7006_p2), [#allocation3], %s6258_s29 }
  0x6f   : > { %6000 = dma.done.wait (%p7007_p1), %s241_s6, 1024  }
  0x70   : > { %6002 = vsyncadd (%p7007_p1), %s241_s6, 4294966272  ;;  %s249_s13 = sand.u32 1, %s6084_s0   ;;  %s6270_s21 = scalar_lea.vmem [#allocation6], %s6258_s29 }
  0x71   : > { %s250_s7 = scalar_lea.sflag [#allocation7], %s249_s13 }
  0x72   : > { %6004 = dma.done.wait (%p7007_p1), %s250_s7, 2048  }
  0x73   : > { %6006 = vsyncadd (%p7007_p1), %s250_s7, 4294965248  ;;  %v6277_v0 = vld [vmem:[%s6270_s21] sm:$0xff]  ;;  %v6283_v2 = vld [vmem:[%s6270_s21 + $0x8] sm:$0xff]  ;;  %s325_s26 = sld [smem:[#allocation2]]  ;;  %s6722_s12 = scalar_lea.vmem [#allocation8], %s6258_s29 }
  0x74   : > { %v6280_v1 = vld [vmem:[%s6262_s14] sm:$0xff]  ;;  %v430_v3 = vmul.f32 %v6277_v0, %v6277_v0  ;;  %v6290_v5 = vld [vmem:[%s6262_s14 + $0x10] sm:$0xff]  ;;  %v431_v6 = vmul.f32 %v6283_v2, %v6283_v2  ;;  %v6297_v8 = vld [vmem:[%s6270_s21 + $0x18] sm:$0xff]  ;;  %s6923_s9 = scalar_lea.vmem [#allocation9], %s6258_s29  ;;  %s4892_s16 = sshll.u32 %s6084_s0, 10 }
  0x75   : > { %v326_v4 = vmul.f32 %v6280_v1, %v6280_v1  ;;  %v328_v7 = vmul.f32 %v6290_v5, %v6290_v5  ;;  %v6300_v9 = vld [vmem:[%s6270_s21 + $0x10] sm:$0xff]  ;;  %v433_v10 = vmul.f32 %v6297_v8, %v6297_v8  ;;  %v6307_v12 = vld [vmem:[%s6262_s14 + $0x18] sm:$0xff]  ;;  %v6310_v13 = vld [vmem:[%s6262_s14 + $0x8] sm:$0xff]  ;;  %s4743_s8 = sshll.u32 %s6923_s9, 4  ;;  %s6935_s30 = scalar_lea.hbm %s6988_s4, %s4892_s16  ;;  %s6937_s8 = int_to_ptr.vmem [resolvable:$true] %s4743_s8 }
  0x76   : > { %438 = vadd.xlane.f32.xlu1 %v430_v3  ;;  %v432_v11 = vmul.f32 %v6300_v9, %v6300_v9  ;;  %v329_v14 = vmul.f32 %v6307_v12, %v6307_v12  ;;  %v327_v15 = vmul.f32 %v6310_v13, %v6310_v13  ;;  %v6317_v16 = vld [vmem:[%s6262_s14 + $0x30] sm:$0xff]  ;;  %v6320_v17 = vld [vmem:[%s6262_s14 + $0x20] sm:$0xff]  ;;  %v6327_v20 = vld [vmem:[%s6262_s14 + $0x38] sm:$0xff]  ;;  %s4729_s0 = scalar_lea.sflag [#allocation5], %s6255_s15  ;;  %s5955_s5 = scalar_lea.vmem %s6937_s8, 1024 }
  0x77   : > { %334 = vadd.xlane.f32.xlu0 %v326_v4  ;;  %v332_v18 = vmul.f32 %v6317_v16, %v6317_v16  ;;  %v330_v19 = vmul.f32 %v6320_v17, %v6320_v17  ;;  %v6330_v21 = vld [vmem:[%s6262_s14 + $0x28] sm:$0xff]  ;;  %v333_v22 = vmul.f32 %v6327_v20, %v6327_v20  ;;  %v6340_v25 = vld [vmem:[%s6270_s21 + $0x20] sm:$0xff]  ;;  %v6347_v28 = vld [vmem:[%s6270_s21 + $0x38] sm:$0xff]  ;;  %p5956_p13 = scmp.ne.s32.totalorder %s6937_s8, %s5955_s5  ;;  %p7008_p7 = scmp.ne.s32.totalorder %s6997_s27, 0 }
  0x78   : > { %v331_v23 = vmul.f32 %v6330_v21, %v6330_v21  ;;  %v6337_v24 = vld [vmem:[%s6270_s21 + $0x28] sm:$0xff]  ;;  %v434_v27 = vmul.f32 %v6340_v25, %v6340_v25  ;;  %v6350_v29 = vld [vmem:[%s6270_s21 + $0x30] sm:$0xff]  ;;  %v437_v30 = vmul.f32 %v6347_v28, %v6347_v28  ;;  %s6032_s1 = smov [#allocation9]  }
  0x79   : > { %v435_v26 = vmul.f32 %v6337_v24, %v6337_v24  ;;  %v436_v31 = vmul.f32 %v6350_v29, %v6350_v29  ;;  %p5957_p6 = pnand %p5956_p13, %p7008_p7  ;;  %s5959_s23 = sshll.u32 %s6032_s1, 4  ;;  %s5960_s23 = int_to_ptr.vmem [resolvable:$false] %s5959_s23 }
  0x7a   : > { %440 = vadd.xlane.f32.xlu1 %v431_v6  ;;  %s5961_s24 = scalar_lea.vmem %s5960_s23, 2048  ;;  %p5962_p12 = scmp.lt.s32.totalorder %s6937_s8, %s5960_s23 }
  0x7b   : > { %338 = vadd.xlane.f32.xlu0 %v328_v7  ;;  %p5958_p9 = pneg %p5957_p6  ;;  %p5963_p0 = scmp.lt.s32.totalorder %s5961_s24, %s5955_s5 }
  0x7d   : > { %p5964_p8 = por %p5963_p0, %p5962_p12 }
  0x7e   : > { %444 = vadd.xlane.f32.xlu1 %v433_v10 }
  0x7f   : > { %442 = vadd.xlane.f32.xlu0 %v432_v11  ;;  %p5965_p10 = pnand %p5964_p8, %p5958_p9 }
  0x82   : > { %340 = vadd.xlane.f32.xlu1 %v329_v14 }
  0x83   : > { %336 = vadd.xlane.f32.xlu0 %v327_v15 }
  0x86   : > { %346 = vadd.xlane.f32.xlu1 %v332_v18 }
  0x87   : > { %342 = vadd.xlane.f32.xlu0 %v330_v19 }
  0x8a   : > { %348 = vadd.xlane.f32.xlu1 %v333_v22 }
  0x8b   : > { %344 = vadd.xlane.f32.xlu0 %v331_v23 }
  0x8e   : > { %448 = vadd.xlane.f32.xlu1 %v435_v26 }
  0x8f   : > { %446 = vadd.xlane.f32.xlu0 %v434_v27 }
  0x92   : > { %452 = vadd.xlane.f32.xlu1 %v437_v30 }
  0x93   : > { %450 = vadd.xlane.f32.xlu0 %v436_v31 }
 0x103   : > { %v439_v32 = vpop.xlane.xlu1 %438 }
 0x104   : > { %v335_v33 = vpop.xlane.xlu0 %334  ;;  %5753 = vrsqrt.f32 %v439_v32  ;;  %vm456_vm0 = vcmp.eq.f32.partialorder %v439_v32, inf  ;;  %vm458_vm1 = vcmp.eq.f32.partialorder %v439_v32, 0.0  ;;  %v459_v43 = vand.u32 2147483648, %v439_v32 }
 0x105   : > { %5755 = vrsqrt.f32 %v335_v33  ;;  %vm352_vm2 = vcmp.eq.f32.partialorder %v335_v33, inf  ;;  %v355_v46 = vand.u32 2147483648, %v335_v33  ;;  %vm354_vm3 = vcmp.eq.f32.partialorder %v335_v33, 0.0 }
 0x107   : > { %v441_v34 = vpop.xlane.xlu1 %440 }
 0x108   : > { %v6356_v35 = vpop.xlane.xlu0 %338  ;;  %5757 = vrsqrt.f32 %v441_v34  ;;  %vm463_vm4 = vcmp.eq.f32.partialorder %v441_v34, inf  ;;  %v466_v54 = vand.u32 2147483648, %v441_v34  ;;  %vm465_vm5 = vcmp.eq.f32.partialorder %v441_v34, 0.0 }
 0x109   : > { %5759 = vrsqrt.f32 %v6356_v35  ;;  %vm366_vm6 = vcmp.eq.f32.partialorder %v6356_v35, inf  ;;  %v369_v62 = vand.u32 2147483648, %v6356_v35  ;;  %vm368_vm11 = vcmp.eq.f32.partialorder %v6356_v35, 0.0 }
 0x10b   : > { %v445_v36 = vpop.xlane.xlu1 %444 }
 0x10c   : > { %v443_v37 = vpop.xlane.xlu0 %442  ;;  %5761 = vrsqrt.f32 %v445_v36  ;;  %vm477_vm7 = vcmp.eq.f32.partialorder %v445_v36, inf  ;;  %vm479_vm8 = vcmp.eq.f32.partialorder %v445_v36, 0.0  ;;  %v480_v4 = vand.u32 2147483648, %v445_v36 }
 0x10d   : > { %5763 = vrsqrt.f32 %v443_v37  ;;  %vm470_vm9 = vcmp.eq.f32.partialorder %v443_v37, inf  ;;  %v473_v14 = vand.u32 2147483648, %v443_v37  ;;  %vm472_vm10 = vcmp.eq.f32.partialorder %v443_v37, 0.0 }
 0x10e   : > { %v5754_v38 = vpop.eup %5753 }
 0x10f   : > { %v5756_v39 = vpop.eup %5755  ;;  %v455_v40 = vmul.f32 %v5754_v38, %v439_v32  ;;  %v6359_v41 = vpop.xlane.xlu1 %340 }
 0x110   : > { %v6361_v42 = vpop.xlane.xlu0 %336  ;;  %v351_v44 = vmul.f32 %v5756_v39, %v335_v33  ;;  %5765 = vrsqrt.f32 %v6359_v41  ;;  %vm373_vm12 = vcmp.eq.f32.partialorder %v6359_v41, inf  ;;  %vm375_vm14 = vcmp.eq.f32.partialorder %v6359_v41, 0.0 }
 0x111   : > { %v457_v45 = vsel %vm456_vm0, %v439_v32, %v455_v40  ;;  %5767 = vrsqrt.f32 %v6361_v42  ;;  %vm359_vm13 = vcmp.eq.f32.partialorder %v6361_v42, inf  ;;  %v362_v40 = vand.u32 2147483648, %v6361_v42 }
 0x112   : > { %v5758_v47 = vpop.eup %5757  ;;  %v460_v48 = vsel %vm458_vm1, %v459_v43, %v457_v45  ;;  %v353_v49 = vsel %vm352_vm2, %v335_v33, %v351_v44  ;;  %vm361_vm15 = vcmp.eq.f32.partialorder %v6361_v42, 0.0 }
 0x113   : > { %v5760_v50 = vpop.eup %5759  ;;  %v510_v51 = vmax.f32 %v460_v48, 1e-12  ;;  %v356_v52 = vsel %vm354_vm3, %v355_v46, %v353_v49  ;;  %v462_v53 = vmul.f32 %v5758_v47, %v441_v34  ;;  %v6368_v3 = vpop.xlane.xlu1 %346 }
 0x114   : > { %v365_v56 = vmul.f32 %v5760_v50, %v6356_v35  ;;  %v406_v58 = vmax.f32 %v356_v52, 1e-12  ;;  %v6370_v7 = vpop.xlane.xlu0 %342  ;;  %vm394_vm0 = vcmp.eq.f32.partialorder %v6368_v3, inf  ;;  %vm396_vm1 = vcmp.eq.f32.partialorder %v6368_v3, 0.0 }
 0x115   : > { %v464_v55 = vsel %vm463_vm4, %v441_v34, %v462_v53  ;;  %5769 = vrcp.f32 %v510_v51  ;;  %v6395_v51 = vstv %s325_s26  ;;  %vm380_vm2 = vcmp.eq.f32.partialorder %v6370_v7, inf }
 0x116   : > { %v5762_v57 = vpop.eup %5761  ;;  %v467_v59 = vsel %vm465_vm5, %v466_v54, %v464_v55  ;;  %v367_v10 = vsel %vm366_vm6, %v6356_v35, %v365_v56  ;;  %vm382_vm3 = vcmp.eq.f32.partialorder %v6370_v7, 0.0 }
 0x117   : > { %v5764_v60 = vpop.eup %5763  ;;  %v511_v61 = vmax.f32 %v467_v59, 1e-12  ;;  %v476_v63 = vmul.f32 %v5762_v57, %v445_v36  ;;  %v370_v30 = vsel %vm368_vm11, %v369_v62, %v367_v10  ;;  %v6377_v33 = vpop.xlane.xlu1 %348 }
 0x118   : > { %v469_v6 = vmul.f32 %v5764_v60, %v443_v37  ;;  %v6381_v35 = vpop.xlane.xlu0 %344  ;;  %vm403_vm11 = vcmp.eq.f32.partialorder %v6377_v33, 0.0 }
 0x119   : > { %5771 = vrcp.f32 %v511_v61  ;;  %v478_v11 = vsel %vm477_vm7, %v445_v36, %v476_v63  ;;  %v408_v36 = vmax.f32 %v370_v30, 1e-12 }
 0x11a   : > { %v5766_v15 = vpop.eup %5765  ;;  %5773 = vrcp.f32 %v406_v58  ;;  %v481_v18 = vsel %vm479_vm8, %v480_v4, %v478_v11  ;;  %v471_v19 = vsel %vm470_vm9, %v443_v37, %v469_v6  ;;  %v376_v37 = vand.u32 2147483648, %v6359_v41 }
 0x11b   : > { %v5768_v22 = vpop.eup %5767  ;;  %v513_v23 = vmax.f32 %v481_v18, 1e-12  ;;  %v474_v26 = vsel %vm472_vm10, %v473_v14, %v471_v19  ;;  %v372_v27 = vmul.f32 %v5766_v15, %v6359_v41  ;;  %v6389_v46 = vpop.xlane.xlu1 %448  ;;  %v397_v11 = vand.u32 2147483648, %v6368_v3 }
 0x11c   : > { %v512_v31 = vmax.f32 %v474_v26, 1e-12  ;;  %v358_v32 = vmul.f32 %v5768_v22, %v6361_v42  ;;  %v6392_v50 = vpop.xlane.xlu0 %446  ;;  %vm491_vm4 = vcmp.eq.f32.partialorder %v6389_v46, inf  ;;  %vm493_vm5 = vcmp.eq.f32.partialorder %v6389_v46, 0.0 }
 0x11d   : > { %5775 = vrcp.f32 %v513_v23  ;;  %v374_v34 = vsel %vm373_vm12, %v6359_v41, %v372_v27  ;;  %v383_v23 = vand.u32 2147483648, %v6370_v7  ;;  %vm484_vm6 = vcmp.eq.f32.partialorder %v6392_v50, inf }
 0x11e   : > { %5777 = vrcp.f32 %v512_v31  ;;  %v360_v38 = vsel %vm359_vm13, %v6361_v42, %v358_v32  ;;  %v377_v43 = vsel %vm375_vm14, %v376_v37, %v374_v34  ;;  %v494_v31 = vand.u32 2147483648, %v6389_v46 }
 0x11f   : > { %v5770_v39 = vpop.eup %5769  ;;  %5779 = vrsqrt.f32 %v6368_v3  ;;  %v363_v44 = vsel %vm361_vm15, %v362_v40, %v360_v38  ;;  %v409_v49 = vmax.f32 %v377_v43, 1e-12  ;;  %v6402_v58 = vpop.xlane.xlu1 %452  ;;  %vm486_vm7 = vcmp.eq.f32.partialorder %v6392_v50, 0.0 }
 0x120   : > { %5781 = vrcp.f32 %v408_v36  ;;  %v551_v47 = vmul.f32 %v5770_v39, %v6277_v0  ;;  %v407_v52 = vmax.f32 %v363_v44, 1e-12  ;;  %v6408_v61 = vpop.xlane.xlu0 %450  ;;  %vm505_vm8 = vcmp.eq.f32.partialorder %v6402_v58, inf }
 0x121   : > { %5783 = vrsqrt.f32 %v6370_v7  ;;  %vm401_vm9 = vcmp.eq.f32.partialorder %v6377_v33, inf  ;;  %vm507_vm10 = vcmp.eq.f32.partialorder %v6402_v58, 0.0  ;;  %vm498_vm12 = vcmp.eq.f32.partialorder %v6408_v61, inf }
 0x122   : > { %v560_v53 = vand.u32 4294901760, %v551_v47  ;;  %5785 = vrcp.f32 %v409_v49  ;;  %v487_v49 = vand.u32 2147483648, %v6392_v50  ;;  %vm500_vm13 = vcmp.eq.f32.partialorder %v6408_v61, 0.0 }
 0x123   : > { %v5772_v45 = vpop.eup %5771  ;;  %5787 = vrcp.f32 %v407_v52  ;;  %vm387_vm14 = vcmp.eq.f32.partialorder %v6381_v35, inf  ;;  %vm389_vm15 = vcmp.eq.f32.partialorder %v6381_v35, 0.0 }
 0x124   : > { %v5774_v48 = vpop.eup %5773  ;;  %v552_v41 = vmul.f32 %v5772_v45, %v6283_v2  ;;  %5789 = vrsqrt.f32 %v6389_v46 }
 0x125   : > { %v535_v55 = vmul.f32 %v5774_v48, %v6395_v51  ;;  %5791 = vrsqrt.f32 %v6392_v50 }
 0x126   : > { %v563_v42 = vand.u32 4294901760, %v552_v41  ;;  %5793 = vrsqrt.f32 %v6402_v58 }
 0x127   : > { %v5776_v54 = vpop.eup %5775  ;;  %v543_v2 = vmul.f32 %v535_v55, %v6280_v1  ;;  %v6415_v1 = vsub.f32 %v551_v47, %v560_v53  ;;  %5795 = vrsqrt.f32 %v6408_v61 }
 0x128   : > { %v5778_v56 = vpop.eup %5777  ;;  %v6399_v57 = vpack.c.bf16 %v563_v42, %v560_v53  ;;  %v554_v0 = vmul.f32 %v5776_v54, %v6297_v8  ;;  %5797 = vrsqrt.f32 %v6377_v33 }
 0x129   : > { %v553_v59 = vmul.f32 %v5778_v56, %v6300_v9  ;;  %v5780_v60 = vpop.eup %5779  ;;  %v6412_v8 = vand.u32 4294901760, %v543_v2  ;;  %v6417_v9 = vsub.f32 %v552_v41, %v563_v42  ;;  %v649_v19 = vand.u32 4294901760, %v6415_v1 }
 0x12a   : > { %5422 = vmatprep.subr.bf16.mxu0 %v6399_v57  ;;  %v1065_v62 = vand.u32 4294901760, %v554_v0  ;;  %v5782_v4 = vpop.eup %5781  ;;  %v393_v6 = vmul.f32 %v5780_v60, %v6368_v3  ;;  %5799 = vrsqrt.f32 %v6381_v35 }
 0x12b   : > { %5424 = vmatpush3.bf16.xpose.msra.mxu0 %v6399_v57  ;;  %v1062_v63 = vand.u32 4294901760, %v553_v59  ;;  %v6423_v10 = vsub.f32 %v543_v2, %v6412_v8  ;;  %v5784_v15 = vpop.eup %5783  ;;  %v656_v22 = vand.u32 4294901760, %v6417_v9  ;;  %v537_v26 = vmul.f32 %v5782_v4, %v6395_v51 }
 0x12c   : > { %v395_v30 = vsel %vm394_vm0, %v6368_v3, %v393_v6  ;;  %v5786_v34 = vpop.eup %5785  ;;  %v379_v36 = vmul.f32 %v5784_v15, %v6370_v7  ;;  %v650_v37 = vsub.f32 %v6415_v1, %v649_v19  ;;  %v6461_v45 = vsub.f32 %v554_v0, %v1065_v62 }
 0x12d   : > { %v6428_v14 = vpack.c.bf16 %v1065_v62, %v1062_v63  ;;  %v628_v18 = vand.u32 4294901760, %v6423_v10  ;;  %v6439_v27 = vsub.f32 %v553_v59, %v1062_v63  ;;  %v657_v38 = vsub.f32 %v6417_v9, %v656_v22  ;;  %v5788_v40 = vpop.eup %5787 }
 0x12e   : > { %v545_v39 = vmul.f32 %v537_v26, %v6290_v5  ;;  %v5790_v47 = vpop.eup %5789  ;;  %v6465_v48 = vsel %vm396_vm1, %v397_v11, %v395_v30  ;;  %v651_v5 = vand.u32 4294901760, %v650_v37  ;;  %v1158_v3 = vand.u32 4294901760, %v6461_v45 }
 0x12f   : > { %5446 = vmatprep.subr.bf16.mxu1 %v6428_v14  ;;  %v629_v32 = vsub.f32 %v6423_v10, %v628_v18  ;;  %v1151_v44 = vand.u32 4294901760, %v6439_v27  ;;  %v658_v41 = vand.u32 4294901760, %v657_v38  ;;  %v5792_v52 = vpop.eup %5791  ;;  %v381_v55 = vsel %vm380_vm2, %v6370_v7, %v379_v36 }
 0x130   : > { %5448 = vmatpush3.bf16.xpose.msra.mxu1 %v6428_v14  ;;  %v6470_v53 = vand.u32 4294901760, %v545_v39  ;;  %v5794_v54 = vpop.eup %5793  ;;  %v536_v0 = vmul.f32 %v5788_v40, %v6395_v51  ;;  %v538_v2 = vmul.f32 %v5786_v34, %v6395_v51  ;;  %v490_v60 = vmul.f32 %v5790_v47, %v6389_v46 }
 0x131   : > { %v630_v43 = vand.u32 4294901760, %v629_v32  ;;  %v1152_v42 = vsub.f32 %v6439_v27, %v1151_v44  ;;  %v6479_v56 = vpack.c.bf16 %v658_v41, %v651_v5  ;;  %v5796_v59 = vpop.eup %5795  ;;  %v1159_v4 = vsub.f32 %v6461_v45, %v1158_v3 }
 0x132   : > { %v6486_v62 = vsub.f32 %v545_v39, %v6470_v53  ;;  %v483_v6 = vmul.f32 %v5792_v52, %v6392_v50  ;;  %v544_v11 = vmul.f32 %v536_v0, %v6310_v13  ;;  %v546_v15 = vmul.f32 %v538_v2, %v6307_v12  ;;  %v5798_v26 = vpop.eup %5797 }
 0x133   : > { %5089 = vmatprep.mubr.f32.mxu0 %v630_v43  ;;  %v1153_v63 = vand.u32 4294901760, %v1152_v42  ;;  %5426 = vmatprep.subr.bf16.mxu0 %v6479_v56  ;;  %v504_v30 = vmul.f32 %v5794_v54, %v6402_v58  ;;  %v508_v32 = vand.u32 2147483648, %v6402_v58  ;;  %v1160_v36 = vand.u32 4294901760, %v1159_v4 }
 0x134   : > { %v1130_v34 = vand.u32 4294901760, %v6486_v62  ;;  %v5800_v37 = vpop.eup %5799  ;;  %v384_v38 = vsel %vm382_vm3, %v383_v23, %v381_v55  ;;  %v497_v39 = vmul.f32 %v5796_v59, %v6408_v61  ;;  %v6503_v40 = vand.u32 4294901760, %v544_v11 }
 0x135   : > { %v6505_v13 = vand.u32 4294901760, %v546_v15  ;;  %v492_v12 = vsel %vm491_vm4, %v6389_v46, %v490_v60  ;;  %v5449_v7 = vpack.c.bf16 %v1160_v36, %v1153_v63  ;;  %v400_v23 = vmul.f32 %v5798_v26, %v6377_v33 }
 0x136   : > { %v1131_v43 = vsub.f32 %v6486_v62, %v1130_v34  ;;  %v485_v47 = vsel %vm484_vm6, %v6392_v50, %v483_v6  ;;  %v6519_v5 = vsub.f32 %v544_v11, %v6503_v40  ;;  %v506_v52 = vsel %vm505_vm8, %v6402_v58, %v504_v30 }
 0x137   : > { %v6522_v41 = vsub.f32 %v546_v15, %v6505_v13  ;;  %v501_v42 = vand.u32 2147483648, %v6408_v61  ;;  %5450 = vmatprep.subr.bf16.mxu1 %v5449_v7  ;;  %v495_v55 = vsel %vm493_vm5, %v494_v31, %v492_v12  ;;  %v499_v0 = vsel %vm498_vm12, %v6408_v61, %v497_v39 }
 0x138   : > { %v1132_v54 = vand.u32 4294901760, %v1131_v43  ;;  %v638_v2 = vand.u32 4294901760, %v6519_v5  ;;  %v412_v60 = vmax.f32 %v6465_v48, 1e-12  ;;  %v386_v63 = vmul.f32 %v5800_v37, %v6381_v35 }
 0x139   : > { %v1140_v59 = vand.u32 4294901760, %v6522_v41  ;;  %v488_v4 = vsel %vm486_vm7, %v487_v49, %v485_v47  ;;  %v410_v6 = vmax.f32 %v384_v38, 1e-12  ;;  %v509_v46 = vsel %vm507_vm10, %v508_v32, %v506_v52 }
 0x13a   : > { %5131 = vmatprep.mubr.f32.mxu1 %v1132_v54  ;;  %v639_v31 = vsub.f32 %v6519_v5, %v638_v2  ;;  %v404_v11 = vand.u32 2147483648, %v6377_v33  ;;  %v390_v15 = vand.u32 2147483648, %v6381_v35  ;;  %v515_v26 = vmax.f32 %v495_v55, 1e-12 }
 0x13b   : > { %v1141_v48 = vsub.f32 %v6522_v41, %v1140_v59  ;;  %v502_v50 = vsel %vm500_vm13, %v501_v42, %v499_v0  ;;  %v402_v58 = vsel %vm401_vm9, %v6377_v33, %v400_v23  ;;  %v514_v49 = vmax.f32 %v488_v4, 1e-12 }
 0x13c   : > { %v640_v30 = vand.u32 4294901760, %v639_v31  ;;  %5801 = vrcp.f32 %v412_v60  ;;  %v388_v36 = vsel %vm387_vm14, %v6381_v35, %v386_v63  ;;  %v517_v37 = vmax.f32 %v509_v46, 1e-12 }
 0x13d   : > { %v1142_v32 = vand.u32 4294901760, %v1141_v48  ;;  %5803 = vrcp.f32 %v410_v6  ;;  %v516_v38 = vmax.f32 %v502_v50, 1e-12  ;;  %v5429_v61 = vpack.c.bf16 %v6417_v9, %v6415_v1 }
 0x13e   : > { %5090 = vmatmul.mubr.f32.vlgmr.msra.gmra.mrb[0].mxu0 %v640_v30  ;;  %v405_v39 = vsel %vm403_vm11, %v404_v11, %v402_v58  ;;  %5805 = vrcp.f32 %v515_v26  ;;  %v5453_v12 = vpack.c.bf16 %v6461_v45, %v6439_v27  ;;  %v391_v43 = vsel %vm389_vm15, %v390_v15, %v388_v36 }
 0x13f   : > { %5132 = vmatmul.mubr.f32.vlgmr.msra.gmra.mrb[0].mxu1 %v1142_v32  ;;  %5428 = vmatpush3.bf16.xpose.msra.mxu0 %v6479_v56  ;;  %5807 = vrcp.f32 %v514_v49  ;;  %v413_v35 = vmax.f32 %v405_v39, 1e-12  ;;  %v411_v33 = vmax.f32 %v391_v43, 1e-12  ;;  %v5437_v54 = vpack.c.bf16 %v656_v22, %v649_v19 }
 0x140   : > { %5452 = vmatpush3.bf16.xpose.msra.mxu1 %v5449_v7  ;;  %5096 = vmatprep.mubr.f32.mxu0 %v6412_v8  ;;  %5809 = vrcp.f32 %v517_v37  ;;  %v5461_v55 = vpack.c.bf16 %v1158_v3, %v1151_v44  ;;  %vm2567_vm0 = vcmask 130048  }
 0x141   : > { %5430 = vmatprep.subr.bf16.mxu0 %v5429_v61  ;;  %5138 = vmatprep.mubr.f32.mxu1 %v6470_v53  ;;  %5811 = vrcp.f32 %v516_v38 }
 0x142   : > { %5454 = vmatprep.subr.bf16.mxu1 %v5453_v12  ;;  %5813 = vrcp.f32 %v413_v35 }
 0x143   : > { %5815 = vrcp.f32 %v411_v33 }
 0x146   : > { %5097 = vmatmul.mubr.f32.vlgmr.msra.gmra.mrb[0].mxu0 %v6503_v40  ;;  %v5802_v56 = vpop.eup %5801 }
 0x147   : > { %5139 = vmatmul.mubr.f32.vlgmr.msra.gmra.mrb[0].mxu1 %v6505_v13  ;;  %5432 = vmatpush3.bf16.xpose.msra.mxu0 %v5429_v61  ;;  %v5804_v7 = vpop.eup %5803  ;;  %v541_v19 = vmul.f32 %v5802_v56, %v6395_v51 }
 0x148   : > { %5456 = vmatpush3.bf16.xpose.msra.mxu1 %v5453_v12  ;;  %5103 = vmatprep.mubr.f32.mxu0 %v6423_v10  ;;  %v5806_v23 = vpop.eup %5805  ;;  %v539_v63 = vmul.f32 %v5804_v7, %v6395_v51 }
 0x149   : > { %5434 = vmatprep.subr.bf16.mxu0 %v6399_v57  ;;  %5145 = vmatprep.mubr.f32.mxu1 %v6486_v62  ;;  %v5808_v47 = vpop.eup %5807  ;;  %v556_v60 = vmul.f32 %v5806_v23, %v6337_v24 }
 0x14a   : > { %5458 = vmatprep.subr.bf16.mxu1 %v6428_v14  ;;  %v5810_v52 = vpop.eup %5809  ;;  %v555_v0 = vmul.f32 %v5808_v47, %v6340_v25  ;;  %v547_v44 = vmul.f32 %v539_v63, %v6320_v17 }
 0x14b   : > { %v5812_v42 = vpop.eup %5811  ;;  %v558_v9 = vmul.f32 %v5810_v52, %v6347_v28  ;;  %v1567_v27 = vand.u32 4294901760, %v556_v60  ;;  %v549_v28 = vmul.f32 %v541_v19, %v6317_v16 }
 0x14c   : > { %v557_v1 = vmul.f32 %v5812_v42, %v6350_v29  ;;  %v5814_v22 = vpop.eup %5813  ;;  %v1564_v24 = vand.u32 4294901760, %v555_v0  ;;  %v6605_v10 = vand.u32 4294901760, %v547_v44 }
 0x14d   : > { %v5816_v25 = vpop.eup %5815  ;;  %v2069_v29 = vand.u32 4294901760, %v558_v9  ;;  %v542_v4 = vmul.f32 %v5814_v22, %v6395_v51  ;;  %v6609_v62 = vsub.f32 %v556_v60, %v1567_v27  ;;  %v6611_v17 = vand.u32 4294901760, %v549_v28  ;;  %v317_v22 = vld [vmem:[%s6722_s12] sm:$0xff] }
 0x14e   : > { %5104 = vmatmul.mubr.f32.vlgmr.msra.gmra.mrb[0].mxu0 %v6519_v5  ;;  %v2066_v45 = vand.u32 4294901760, %v557_v1  ;;  %v540_v3 = vmul.f32 %v5816_v25, %v6395_v51  ;;  %v6639_v48 = vpack.c.bf16 %v1567_v27, %v1564_v24  ;;  %v318_v25 = vld [vmem:[%s6722_s12 + $0x8] sm:$0xff]  ;;  %v2647_v27 = vand.u32 4294901760, %v317_v22 }
 0x14f   : > { %5146 = vmatmul.mubr.f32.vlgmr.msra.gmra.mrb[0].mxu1 %v6522_v41  ;;  %5436 = vmatpush3.bf16.xpose.msra.mxu0 %v6399_v57  ;;  %v550_v5 = vmul.f32 %v542_v4, %v6327_v20  ;;  %v6624_v41 = vsub.f32 %v547_v44, %v6605_v10  ;;  %v6629_v6 = vsub.f32 %v549_v28, %v6611_v17  ;;  %v2650_v44 = vand.u32 4294901760, %v318_v25 }
 0x150   : > { %5460 = vmatpush3.bf16.xpose.msra.mxu1 %v6428_v14  ;;  %5110 = vmatprep.mubr.f32.mxu0 %v628_v18  ;;  %v6607_v18 = vsub.f32 %v555_v0, %v1564_v24  ;;  %v6613_v16 = vsub.f32 %v557_v1, %v2066_v45  ;;  %v548_v51 = vmul.f32 %v540_v3, %v6330_v21  ;;  %v319_v24 = vld [vmem:[%s6722_s12 + $0x10] sm:$0xff] }
 0x151   : > { %5438 = vmatprep.subr.bf16.mxu0 %v5437_v54  ;;  %5152 = vmatprep.mubr.f32.mxu1 %v1130_v34  ;;  %v6615_v34 = vsub.f32 %v558_v9, %v2069_v29  ;;  %v6635_v20 = vand.u32 4294901760, %v550_v5  ;;  %v1632_v11 = vand.u32 4294901760, %v6624_v41  ;;  %v6650_v50 = vpack.c.bf16 %v2069_v29, %v2066_v45  ;;  %v320_v45 = vld [vmem:[%s6722_s12 + $0x18] sm:$0xff] }
 0x152   : > { %5462 = vmatprep.subr.bf16.mxu1 %v5461_v55  ;;  %v2155_v46 = vand.u32 4294901760, %v6613_v16  ;;  %v6633_v31 = vand.u32 4294901760, %v548_v51  ;;  %v2134_v58 = vand.u32 4294901760, %v6629_v6  ;;  %v3155_v29 = vand.u32 4294901760, %v319_v24 }
 0x153   : > { %v2162_v21 = vand.u32 4294901760, %v6615_v34  ;;  %v1633_v32 = vsub.f32 %v6624_v41, %v1632_v11  ;;  %v3158_v28 = vand.u32 4294901760, %v320_v45  ;;  %v6728_v3 = vpack.c.bf16 %v2650_v44, %v2647_v27 }
 0x154   : > { %v2156_v49 = vsub.f32 %v6613_v16, %v2155_v46  ;;  %v2135_v38 = vsub.f32 %v6629_v6, %v2134_v58  ;;  %v2735_v4 = vsub.f32 %v317_v22, %v2647_v27 }
 0x155   : > { %v2163_v30 = vsub.f32 %v6615_v34, %v2162_v21  ;;  %v5509_v42 = vpack.c.bf16 %v2162_v21, %v2155_v46 }
 0x156   : > { %5111 = vmatmul.mubr.f32.vlgmr.msra.gmra.mrb[0].mxu0 %v638_v2  ;;  %v1653_v2 = vand.u32 4294901760, %v6607_v18  ;;  %v2157_v61 = vand.u32 4294901760, %v2156_v49  ;;  %v2136_v35 = vand.u32 4294901760, %v2135_v38 }
 0x157   : > { %5153 = vmatmul.mubr.f32.vlgmr.msra.gmra.mrb[0].mxu1 %v1140_v59  ;;  %5440 = vmatpush3.bf16.xpose.msra.mxu0 %v5437_v54  ;;  %v1660_v59 = vand.u32 4294901760, %v6609_v62  ;;  %v2164_v39 = vand.u32 4294901760, %v2163_v30 }
 0x158   : > { %5464 = vmatpush3.bf16.xpose.msra.mxu1 %v5461_v55  ;;  %5117 = vmatprep.mubr.f32.mxu0 %v6412_v8  ;;  %v1654_v15 = vsub.f32 %v6607_v18, %v1653_v2 }
 0x159   : > { %5442 = vmatprep.subr.bf16.mxu0 %v6399_v57  ;;  %5159 = vmatprep.mubr.f32.mxu1 %v6470_v53  ;;  %v1661_v26 = vsub.f32 %v6609_v62, %v1660_v59  ;;  %v5497_v33 = vpack.c.bf16 %v2164_v39, %v2157_v61  ;;  %v5485_v52 = vpack.c.bf16 %v1660_v59, %v1653_v2 }
 0x15a   : > { %5466 = vmatprep.subr.bf16.mxu1 %v6428_v14  ;;  %v1655_v36 = vand.u32 4294901760, %v1654_v15 }
 0x15b   : > { %v1662_v37 = vand.u32 4294901760, %v1661_v26 }
 0x15d   : > { %v5473_v43 = vpack.c.bf16 %v1662_v37, %v1655_v36 }
 0x15e   : > { %5118 = vmatmul.mubr.f32.vlgmr.msra.gmra.mrb[0].mxu0 %v6503_v40 }
 0x15f   : > { %5160 = vmatmul.mubr.f32.vlgmr.msra.gmra.mrb[0].mxu1 %v6505_v13  ;;  %5444 = vmatpush3.bf16.xpose.msra.mxu0 %v6399_v57  ;;  %v1641_v57 = vsub.f32 %v548_v51, %v6633_v31 }
 0x160   : > { %5468 = vmatpush3.bf16.xpose.msra.mxu1 %v6428_v14  ;;  %5124 = vmatprep.mubr.f32.mxu0 %v6412_v8  ;;  %v2143_v14 = vsub.f32 %v550_v5, %v6635_v20 }
 0x161   : > { %5166 = vmatprep.mubr.f32.mxu1 %v6470_v53  ;;  %5470 = vmatprep.subr.bf16.mxu0 %v6639_v48  ;;  %v1642_v12 = vand.u32 4294901760, %v1641_v57  ;;  %v1634_v53 = vand.u32 4294901760, %v1633_v32 }
 0x162   : > { %5494 = vmatprep.subr.bf16.mxu1 %v6650_v50  ;;  %v2144_v8 = vand.u32 4294901760, %v2143_v14 }
 0x163   : > { %v1643_v56 = vsub.f32 %v1641_v57, %v1642_v12 }
 0x164   : > { %v2145_v7 = vsub.f32 %v2143_v14, %v2144_v8 }
 0x165   : > { %v1644_v23 = vand.u32 4294901760, %v1643_v56 }
 0x166   : > { %5125 = vmatmul.mubr.f32.vlgmr.msra.gmra.mrb[0].mxu0 %v6503_v40  ;;  %v2146_v47 = vand.u32 4294901760, %v2145_v7  ;;  %v5477_v40 = vpack.c.bf16 %v6609_v62, %v6607_v18  ;;  %v3243_v18 = vsub.f32 %v319_v24, %v3155_v29  ;;  %v6730_v62 = vpack.c.bf16 %v3158_v28, %v3155_v29 }
 0x167   : > { %5167 = vmatmul.mubr.f32.vlgmr.msra.gmra.mrb[0].mxu1 %v6505_v13  ;;  %5472 = vmatpush3.bf16.xpose.msra.mxu0 %v6639_v48  ;;  %v5501_v13 = vpack.c.bf16 %v6615_v34, %v6613_v16  ;;  %v2736_v16 = vand.u32 4294901760, %v2735_v4 }
 0x168   : > { %5496 = vmatpush3.bf16.xpose.msra.mxu1 %v6650_v50  ;;  %5173 = vmatprep.mubr.f32.mxu0 %v1634_v53  ;;  %v3244_v51 = vand.u32 4294901760, %v3243_v18 }
 0x169   : > { %5474 = vmatprep.subr.bf16.mxu0 %v5473_v43  ;;  %5215 = vmatprep.mubr.f32.mxu1 %v2136_v35  ;;  %v2737_v2 = vsub.f32 %v2735_v4, %v2736_v16 }
 0x16a   : > { %5498 = vmatprep.subr.bf16.mxu1 %v5497_v33 }
 0x16e   : > { %5174 = vmatmul.mubr.f32.vlgmr.msra.gmra.mrb[2].mxu0 %v1644_v23 }
 0x16f   : > { %5216 = vmatmul.mubr.f32.vlgmr.msra.gmra.mrb[2].mxu1 %v2146_v47  ;;  %5476 = vmatpush3.bf16.xpose.msra.mxu0 %v5473_v43 }
 0x170   : > { %5180 = vmatprep.mubr.f32.mxu0 %v6605_v10  ;;  %5500 = vmatpush3.bf16.xpose.msra.mxu1 %v5497_v33 }
 0x171   : > { %5222 = vmatprep.mubr.f32.mxu1 %v6611_v17  ;;  %5478 = vmatprep.subr.bf16.mxu0 %v5477_v40 }
 0x172   : > { %5502 = vmatprep.subr.bf16.mxu1 %v5501_v13 }
 0x176   : > { %5181 = vmatmul.mubr.f32.vlgmr.msra.gmra.mrb[2].mxu0 %v6633_v31 }
 0x177   : > { %5223 = vmatmul.mubr.f32.vlgmr.msra.gmra.mrb[2].mxu1 %v6635_v20  ;;  %5480 = vmatpush3.bf16.xpose.msra.mxu0 %v5477_v40 }
 0x178   : > { %5187 = vmatprep.mubr.f32.mxu0 %v6624_v41  ;;  %5504 = vmatpush3.bf16.xpose.msra.mxu1 %v5501_v13 }
 0x179   : > { %5229 = vmatprep.mubr.f32.mxu1 %v6629_v6  ;;  %5482 = vmatprep.subr.bf16.mxu0 %v6639_v48  ;;  %v3245_v6 = vsub.f32 %v3243_v18, %v3244_v51 }
 0x17a   : > { %5506 = vmatprep.subr.bf16.mxu1 %v6650_v50 }
 0x17e   : > { %5188 = vmatmul.mubr.f32.vlgmr.msra.gmra.mrb[2].mxu0 %v1641_v57 }
 0x17f   : > { %5230 = vmatmul.mubr.f32.vlgmr.msra.gmra.mrb[2].mxu1 %v2143_v14  ;;  %5484 = vmatpush3.bf16.xpose.msra.mxu0 %v6639_v48 }
 0x180   : > { %5194 = vmatprep.mubr.f32.mxu0 %v1632_v11  ;;  %5508 = vmatpush3.bf16.xpose.msra.mxu1 %v6650_v50  ;;  %v2738_v11 = vand.u32 4294901760, %v2737_v2 }
 0x181   : > { %5236 = vmatprep.mubr.f32.mxu1 %v2134_v58  ;;  %5486 = vmatprep.subr.bf16.mxu0 %v5485_v52 }
 0x182   : > { %5510 = vmatprep.subr.bf16.mxu1 %v5509_v42 }
 0x186   : > { %5195 = vmatmul.mubr.f32.vlgmr.msra.gmra.mrb[2].mxu0 %v1642_v12 }
 0x187   : > { %5237 = vmatmul.mubr.f32.vlgmr.msra.gmra.mrb[2].mxu1 %v2144_v8  ;;  %5488 = vmatpush3.bf16.xpose.msra.mxu0 %v5485_v52 }
 0x188   : > { %5201 = vmatprep.mubr.f32.mxu0 %v6605_v10  ;;  %5512 = vmatpush3.bf16.xpose.msra.mxu1 %v5509_v42 }
 0x189   : > { %5243 = vmatprep.mubr.f32.mxu1 %v6611_v17  ;;  %5490 = vmatprep.subr.bf16.mxu0 %v6639_v48 }
 0x18a   : > { %5514 = vmatprep.subr.bf16.mxu1 %v6650_v50 }
 0x18e   : > { %5202 = vmatmul.mubr.f32.vlgmr.msra.gmra.mrb[2].mxu0 %v6633_v31 }
 0x18f   : > { %5244 = vmatmul.mubr.f32.vlgmr.msra.gmra.mrb[2].mxu1 %v6635_v20  ;;  %5492 = vmatpush3.bf16.xpose.msra.mxu0 %v6639_v48 }
 0x190   : > { %5208 = vmatprep.mubr.f32.mxu0 %v6605_v10  ;;  %5516 = vmatpush3.bf16.xpose.msra.mxu1 %v6650_v50  ;;  %v2742_v10 = vsub.f32 %v318_v25, %v2650_v44  ;;  %v3246_v50 = vand.u32 4294901760, %v3245_v6 }
 0x191   : > { %5250 = vmatprep.mubr.f32.mxu1 %v6611_v17  ;;  %v3250_v17 = vsub.f32 %v320_v45, %v3158_v28  ;;  %5518 = vmatprep.subr.bf16.mxu0 %v6728_v3 }
 0x192   : > { %v2743_v34 = vand.u32 4294901760, %v2742_v10  ;;  %5542 = vmatprep.subr.bf16.mxu1 %v6730_v62  ;;  %v6758_v32 = vpack.c.bf16 %v2742_v10, %v2735_v4 }
 0x193   : > { %v3251_v5 = vand.u32 4294901760, %v3250_v17  ;;  %v6760_v36 = vpack.c.bf16 %v3250_v17, %v3243_v18 }
 0x194   : > { %v2744_v59 = vsub.f32 %v2742_v10, %v2743_v34  ;;  %v6762_v37 = vpack.c.bf16 %v2743_v34, %v2736_v16 }
 0x195   : > { %v6764_v38 = vpack.c.bf16 %v3251_v5, %v3244_v51 }
 0x196   : > { %5209 = vmatmul.mubr.f32.vlgmr.msra.gmra.mrb[2].mxu0 %v6633_v31  ;;  %v3252_v31 = vsub.f32 %v3250_v17, %v3251_v5  ;;  %v2745_v15 = vand.u32 4294901760, %v2744_v59 }
 0x197   : > { %5251 = vmatmul.mubr.f32.vlgmr.msra.gmra.mrb[2].mxu1 %v6635_v20  ;;  %5520 = vmatpush3.bf16.msra.mxu0 %v6728_v3 }
 0x198   : > { %5544 = vmatpush3.bf16.msra.mxu1 %v6730_v62  ;;  %v3253_v58 = vand.u32 4294901760, %v3252_v31  ;;  %v6748_v49 = vpack.c.bf16 %v2745_v15, %v2738_v11  ;;  %v322_v11 = vld [vmem:[%s6722_s12 + $0x28] sm:$0xff]  ;;  %v323_v15 = vld [vmem:[%s6722_s12 + $0x30] sm:$0xff] }
 0x19a   : > { %v6750_v30 = vpack.c.bf16 %v3253_v58, %v3246_v50  ;;  %5522 = vmatprep.subr.bf16.mxu0 %v6748_v49 }
 0x19c   : > { %5546 = vmatprep.subr.bf16.mxu1 %v6750_v30 }
 0x239   : > { %v6705_v54 = vpop.f32.mrb[0].mxu0 }
 0x23a   : > { %v6707_v55 = vpop.f32.mrb[0].mxu1  ;;  %v6709_v0 = vpop.f32.mrb[1].mxu0  ;;  %v2571_v19 = vsel %vm2567_vm0, %v6705_v54, -inf }
 0x23b   : > { %v6711_v60 = vpop.f32.mrb[1].mxu1  ;;  %v2568_v1 = vsel %vm2567_vm0, %v6709_v0, -inf  ;;  %v2577_v9 = vsel %vm2567_vm0, %v6707_v55, -inf }
 0x23c   : > { %v2574_v63 = vsel %vm2567_vm0, %v6711_v60, -inf  ;;  %2569 = vmax.xlane.f32.xlu0 %v2568_v1 }
 0x23d   : > { %2575 = vmax.xlane.f32.xlu1 %v2574_v63 }
 0x240   : > { %2572 = vmax.xlane.f32.xlu0 %v2571_v19 }
 0x241   : > { %2578 = vmax.xlane.f32.xlu1 %v2577_v9 }
 0x269   : > { %v6735_v41 = vpop.f32.mrb[2].mxu0 }
 0x26a   : > { %v6738_v46 = vpop.f32.mrb[2].mxu1  ;;  %v6740_v21 = vpop.f32.mrb[3].mxu0  ;;  %v2583_v57 = vsel %vm2567_vm0, %v6735_v41, -inf }
 0x26b   : > { %v6742_v20 = vpop.f32.mrb[3].mxu1  ;;  %v2580_v48 = vsel %vm2567_vm0, %v6740_v21, -inf  ;;  %v2589_v14 = vsel %vm2567_vm0, %v6738_v46, -inf }
 0x26c   : > { %2581 = vmax.xlane.f32.xlu0 %v2580_v48  ;;  %v2586_v26 = vsel %vm2567_vm0, %v6742_v20, -inf  ;;  %v321_v48 = vld [vmem:[%s6722_s12 + $0x20] sm:$0xff] }
 0x26d   : > { %2587 = vmax.xlane.f32.xlu1 %v2586_v26  ;;  %v324_v26 = vld [vmem:[%s6722_s12 + $0x38] sm:$0xff] }
 0x270   : > { %2584 = vmax.xlane.f32.xlu0 %v2583_v57  ;;  %v3666_v57 = vand.u32 4294901760, %v322_v11 }
 0x271   : > { %2590 = vmax.xlane.f32.xlu1 %v2589_v14 }
 0x2c9   : > { %v2570_v39 = vpop.xlane.xlu0 %2569 }
 0x2ca   : > { %v2576_v61 = vpop.xlane.xlu1 %2575  ;;  %v2592_v8 = vsub.f32 %v6709_v0, %v2570_v39 }
 0x2cb   : > { %v2594_v12 = vsub.f32 %v6711_v60, %v2576_v61 }
 0x2cc   : > { %v2600_v43 = vmul.f32 1.442695, %v2592_v8 }
 0x2cd   : > { %v2604_v53 = vmul.f32 1.442695, %v2594_v12  ;;  %v2573_v33 = vpop.xlane.xlu0 %2572 }
 0x2ce   : > { %v2579_v35 = vpop.xlane.xlu1 %2578  ;;  %v2593_v7 = vsub.f32 %v6705_v54, %v2573_v33 }
 0x2cf   : > { %5817 = vpow2.f32 %v2604_v53  ;;  %v2595_v56 = vsub.f32 %v6707_v55, %v2579_v35 }
 0x2d0   : > { %5819 = vpow2.f32 %v2600_v43  ;;  %v2602_v47 = vmul.f32 1.442695, %v2593_v7  ;;  %v6825_v43 = vsub.f32 %v322_v11, %v3666_v57 }
 0x2d1   : > { %v2606_v23 = vmul.f32 1.442695, %v2595_v56 }
 0x2d3   : > { %5821 = vpow2.f32 %v2606_v23 }
 0x2d4   : > { %5823 = vpow2.f32 %v2602_v47 }
 0x2d9   : > { %v5818_v40 = vpop.eup %5817 }
 0x2da   : > { %v5820_v13 = vpop.eup %5819  ;;  %v3149_v52 = vsel %vm2567_vm0, %v5818_v40, 0  ;;  %v2622_v19 = vsel %vm2567_vm0, %v5818_v40, 0.0 }
 0x2db   : > { %v2616_v42 = vsel %vm2567_vm0, %v5820_v13, 0.0  ;;  %v2641_v0 = vsel %vm2567_vm0, %v5820_v13, 0  ;;  %v6773_v60 = vand.u32 4294901760, %v3149_v52 }
 0x2dc   : > { %2617 = vadd.xlane.f32.xlu0 %v2616_v42  ;;  %v6775_v63 = vand.u32 4294901760, %v2641_v0 }
 0x2dd   : > { %v5822_v55 = vpop.eup %5821  ;;  %v3222_v54 = vsub.f32 %v3149_v52, %v6773_v60 }
 0x2de   : > { %v5824_v1 = vpop.eup %5823  ;;  %v3152_v9 = vsel %vm2567_vm0, %v5822_v55, 0  ;;  %v2714_v22 = vsub.f32 %v2641_v0, %v6775_v63  ;;  %v2625_v17 = vsel %vm2567_vm0, %v5822_v55, 0.0 }
 0x2df   : > { %v6781_v25 = vand.u32 4294901760, %v3152_v9  ;;  %v2644_v24 = vsel %vm2567_vm0, %v5824_v1, 0  ;;  %v2619_v27 = vsel %vm2567_vm0, %v5824_v1, 0.0  ;;  %v3223_v44 = vand.u32 4294901760, %v3222_v54 }
 0x2e0   : > { %v6785_v45 = vand.u32 4294901760, %v2644_v24  ;;  %2623 = vadd.xlane.f32.xlu0 %v2622_v19  ;;  %2620 = vadd.xlane.f32.xlu1 %v2619_v27  ;;  %v2715_v29 = vand.u32 4294901760, %v2714_v22 }
 0x2e1   : > { %v3224_v28 = vsub.f32 %v3222_v54, %v3223_v44  ;;  %v6788_v4 = vsub.f32 %v3152_v9, %v6781_v25 }
 0x2e2   : > { %v2716_v10 = vsub.f32 %v2714_v22, %v2715_v29  ;;  %v6791_v18 = vsub.f32 %v2644_v24, %v6785_v45 }
 0x2e3   : > { %v3225_v16 = vand.u32 4294901760, %v3224_v28  ;;  %v3233_v34 = vand.u32 4294901760, %v6788_v4 }
 0x2e4   : > { %2626 = vadd.xlane.f32.xlu1 %v2625_v17  ;;  %v2717_v51 = vand.u32 4294901760, %v2716_v10  ;;  %v2725_v5 = vand.u32 4294901760, %v6791_v18 }
 0x2e5   : > { %5299 = vmatprep.mubr.f32.mxu1 %v3225_v16  ;;  %v3234_v2 = vsub.f32 %v6788_v4, %v3233_v34 }
 0x2e6   : > { %5257 = vmatprep.mubr.f32.mxu0 %v2717_v51  ;;  %v2726_v59 = vsub.f32 %v6791_v18, %v2725_v5 }
 0x2e7   : > { %v3235_v6 = vand.u32 4294901760, %v3234_v2 }
 0x2e8   : > { %v2727_v31 = vand.u32 4294901760, %v2726_v59 }
 0x2e9   : > { %5300 = vmatmul.mubr.f32.vlgmr.msra.gmra.mrb[4].mxu1 %v3235_v6 }
 0x2ea   : > { %5258 = vmatmul.mubr.f32.vlgmr.msra.gmra.mrb[4].mxu0 %v2727_v31  ;;  %5306 = vmatprep.mubr.f32.mxu1 %v6773_v60 }
 0x2eb   : > { %5264 = vmatprep.mubr.f32.mxu0 %v6775_v63  ;;  %5524 = vmatpush3.bf16.msra.mxu0 %v6748_v49 }
 0x2ec   : > { %5548 = vmatpush3.bf16.msra.mxu1 %v6750_v30  ;;  %5526 = vmatprep.subr.bf16.mxu0 %v6758_v32  ;;  %v3663_v30 = vand.u32 4294901760, %v321_v48 }
 0x2ed   : > { %5550 = vmatprep.subr.bf16.mxu1 %v6760_v36 }
 0x2ee   : > { %v6823_v53 = vsub.f32 %v321_v48, %v3663_v30  ;;  %v6855_v42 = vpack.c.bf16 %v3666_v57, %v3663_v30 }
 0x2f0   : > { %v5573_v57 = vpack.c.bf16 %v6825_v43, %v6823_v53 }
 0x2f1   : > { %5307 = vmatmul.mubr.f32.vlgmr.msra.gmra.mrb[4].mxu1 %v6781_v25 }
 0x2f2   : > { %5265 = vmatmul.mubr.f32.vlgmr.msra.gmra.mrb[4].mxu0 %v6785_v45  ;;  %5313 = vmatprep.mubr.f32.mxu1 %v3222_v54 }
 0x2f3   : > { %5271 = vmatprep.mubr.f32.mxu0 %v2714_v22  ;;  %5528 = vmatpush3.bf16.msra.mxu0 %v6758_v32  ;;  %v4171_v32 = vand.u32 4294901760, %v323_v15 }
 0x2f4   : > { %5552 = vmatpush3.bf16.msra.mxu1 %v6760_v36  ;;  %5530 = vmatprep.subr.bf16.mxu0 %v6728_v3  ;;  %v4174_v36 = vand.u32 4294901760, %v324_v26 }
 0x2f5   : > { %5554 = vmatprep.subr.bf16.mxu1 %v6730_v62  ;;  %v6828_v35 = vsub.f32 %v323_v15, %v4171_v32 }
 0x2f6   : > { %v6830_v33 = vsub.f32 %v324_v26, %v4174_v36  ;;  %v6857_v0 = vpack.c.bf16 %v4174_v36, %v4171_v32 }
 0x2f7   : > { %v4260_v23 = vand.u32 4294901760, %v6828_v35 }
 0x2f8   : > { %v4267_v47 = vand.u32 4294901760, %v6830_v33 }
 0x2f9   : > { %5314 = vmatmul.mubr.f32.vlgmr.msra.gmra.mrb[4].mxu1 %v6788_v4  ;;  %v2582_v50 = vpop.xlane.xlu0 %2581 }
 0x2fa   : > { %5272 = vmatmul.mubr.f32.vlgmr.msra.gmra.mrb[4].mxu0 %v6791_v18  ;;  %5320 = vmatprep.mubr.f32.mxu1 %v3223_v44  ;;  %v2588_v58 = vpop.xlane.xlu1 %2587  ;;  %v2596_v49 = vsub.f32 %v6740_v21, %v2582_v50  ;;  %v4268_v13 = vsub.f32 %v6830_v33, %v4267_v47  ;;  %v5605_v36 = vpack.c.bf16 %v4267_v47, %v4260_v23 }
 0x2fb   : > { %5278 = vmatprep.mubr.f32.mxu0 %v2715_v29  ;;  %5556 = vmatpush3.bf16.msra.mxu1 %v6730_v62  ;;  %v2598_v14 = vsub.f32 %v6742_v20, %v2588_v58 }
 0x2fc   : > { %5532 = vmatpush3.bf16.msra.mxu0 %v6728_v3  ;;  %5558 = vmatprep.subr.bf16.mxu1 %v6764_v38  ;;  %v2608_v61 = vmul.f32 1.442695, %v2596_v49  ;;  %v4269_v44 = vand.u32 4294901760, %v4268_v13 }
 0x2fd   : > { %5534 = vmatprep.subr.bf16.mxu0 %v6762_v37  ;;  %v2612_v39 = vmul.f32 1.442695, %v2598_v14  ;;  %v2585_v12 = vpop.xlane.xlu0 %2584  ;;  %v5597_v14 = vpack.c.bf16 %v6830_v33, %v6828_v35 }
 0x2fe   : > { %5825 = vpow2.f32 %v2608_v61  ;;  %v2591_v21 = vpop.xlane.xlu1 %2590  ;;  %v2597_v8 = vsub.f32 %v6735_v41, %v2585_v12  ;;  %v3752_v41 = vand.u32 4294901760, %v6823_v53 }
 0x2ff   : > { %5827 = vpow2.f32 %v2612_v39  ;;  %v2599_v20 = vsub.f32 %v6738_v46, %v2591_v21  ;;  %v3759_v46 = vand.u32 4294901760, %v6825_v43 }
 0x300   : > { %v2610_v56 = vmul.f32 1.442695, %v2597_v8  ;;  %v3753_v40 = vsub.f32 %v6823_v53, %v3752_v41 }
 0x301   : > { %5321 = vmatmul.mubr.f32.vlgmr.msra.gmra.mrb[4].mxu1 %v3233_v34  ;;  %v2614_v7 = vmul.f32 1.442695, %v2599_v20  ;;  %v5581_v32 = vpack.c.bf16 %v3759_v46, %v3752_v41 }
 0x302   : > { %5279 = vmatmul.mubr.f32.vlgmr.msra.gmra.mrb[4].mxu0 %v2725_v5  ;;  %5327 = vmatprep.mubr.f32.mxu1 %v6773_v60  ;;  %5829 = vpow2.f32 %v2610_v56  ;;  %v3754_v22 = vand.u32 4294901760, %v3753_v40 }
 0x303   : > { %5285 = vmatprep.mubr.f32.mxu0 %v6775_v63  ;;  %5536 = vmatpush3.bf16.msra.mxu0 %v6762_v37  ;;  %5831 = vpow2.f32 %v2614_v7  ;;  %v3760_v37 = vsub.f32 %v6825_v43, %v3759_v46 }
 0x304   : > { %5560 = vmatpush3.bf16.msra.mxu1 %v6764_v38  ;;  %5538 = vmatprep.subr.bf16.mxu0 %v6728_v3  ;;  %v4261_v38 = vsub.f32 %v6828_v35, %v4260_v23 }
 0x305   : > { %5562 = vmatprep.subr.bf16.mxu1 %v6730_v62  ;;  %v3761_v27 = vand.u32 4294901760, %v3760_v37 }
 0x307   : > { %v5569_v5 = vpack.c.bf16 %v3761_v27, %v3754_v22 }
 0x308   : > { %v5826_v52 = vpop.eup %5825 }
 0x309   : > { %5328 = vmatmul.mubr.f32.vlgmr.msra.gmra.mrb[4].mxu1 %v6781_v25  ;;  %v5828_v55 = vpop.eup %5827  ;;  %v2628_v54 = vsel %vm2567_vm0, %v5826_v52, 0.0  ;;  %v3657_v1 = vsel %vm2567_vm0, %v5826_v52, 0 }
 0x30a   : > { %5286 = vmatmul.mubr.f32.vlgmr.msra.gmra.mrb[4].mxu0 %v6785_v45  ;;  %5334 = vmatprep.mubr.f32.mxu1 %v6773_v60  ;;  %v6864_v9 = vand.u32 4294901760, %v3657_v1  ;;  %v4165_v19 = vsel %vm2567_vm0, %v5828_v55, 0  ;;  %v4262_v60 = vand.u32 4294901760, %v4261_v38  ;;  %v2634_v10 = vsel %vm2567_vm0, %v5828_v55, 0.0 }
 0x30b   : > { %5292 = vmatprep.mubr.f32.mxu0 %v6775_v63  ;;  %2629 = vadd.xlane.f32.xlu0 %v2628_v54  ;;  %v6869_v24 = vand.u32 4294901760, %v4165_v19 }
 0x30c   : > { %5540 = vmatpush3.bf16.msra.mxu0 %v6728_v3  ;;  %5564 = vmatpush3.bf16.msra.mxu1 %v6730_v62  ;;  %v5830_v29 = vpop.eup %5829  ;;  %v3730_v63 = vsub.f32 %v3657_v1, %v6864_v9  ;;  %v5593_v2 = vpack.c.bf16 %v4269_v44, %v4262_v60 }
 0x30d   : > { %5566 = vmatprep.subr.bf16.mxu0 %v6855_v42  ;;  %5590 = vmatprep.subr.bf16.mxu1 %v6857_v0  ;;  %v5832_v28 = vpop.eup %5831  ;;  %v3660_v4 = vsel %vm2567_vm0, %v5830_v29, 0  ;;  %v2631_v3 = vsel %vm2567_vm0, %v5830_v29, 0.0  ;;  %v4238_v62 = vsub.f32 %v4165_v19, %v6869_v24 }
 0x30e   : > { %v4168_v18 = vsel %vm2567_vm0, %v5832_v28, 0  ;;  %v6879_v17 = vand.u32 4294901760, %v3660_v4  ;;  %2632 = vadd.xlane.f32.xlu1 %v2631_v3  ;;  %v3731_v16 = vand.u32 4294901760, %v3730_v63  ;;  %v2637_v31 = vsel %vm2567_vm0, %v5832_v28, 0.0 }
 0x30f   : > { %2635 = vadd.xlane.f32.xlu0 %v2634_v10  ;;  %v6881_v34 = vand.u32 4294901760, %v4168_v18  ;;  %v4239_v51 = vand.u32 4294901760, %v4238_v62 }
 0x310   : > { %v3732_v59 = vsub.f32 %v3730_v63, %v3731_v16  ;;  %v3740_v6 = vsub.f32 %v3660_v4, %v6879_v17 }
 0x311   : > { %5335 = vmatmul.mubr.f32.vlgmr.msra.gmra.mrb[4].mxu1 %v6781_v25  ;;  %v4240_v48 = vsub.f32 %v4238_v62, %v4239_v51  ;;  %v4248_v11 = vsub.f32 %v4168_v18, %v6881_v34 }
 0x312   : > { %5293 = vmatmul.mubr.f32.vlgmr.msra.gmra.mrb[4].mxu0 %v6785_v45  ;;  %5592 = vmatpush3.bf16.msra.mxu1 %v6857_v0  ;;  %v3733_v15 = vand.u32 4294901760, %v3732_v59  ;;  %v3741_v26 = vand.u32 4294901760, %v3740_v6 }
 0x313   : > { %2638 = vadd.xlane.f32.xlu1 %v2637_v31  ;;  %5568 = vmatpush3.bf16.msra.mxu0 %v6855_v42  ;;  %v4241_v50 = vand.u32 4294901760, %v4240_v48  ;;  %v4249_v25 = vand.u32 4294901760, %v4248_v11 }
 0x314   : > { %5570 = vmatprep.subr.bf16.mxu0 %v5569_v5  ;;  %5594 = vmatprep.subr.bf16.mxu1 %v5593_v2  ;;  %v3742_v58 = vsub.f32 %v3740_v6, %v3741_v26 }
 0x315   : > { %5341 = vmatprep.mubr.f32.mxu0 %v3733_v15  ;;  %5383 = vmatprep.mubr.f32.mxu1 %v4241_v50  ;;  %v4250_v45 = vsub.f32 %v4248_v11, %v4249_v25 }
 0x316   : > { %v3743_v49 = vand.u32 4294901760, %v3742_v58 }
 0x317   : > { %v4251_v30 = vand.u32 4294901760, %v4250_v45 }
 0x318   : > { %5342 = vmatmul.mubr.f32.vlgmr.msra.gmra.mrb[6].mxu0 %v3743_v49 }
 0x319   : > { %5384 = vmatmul.mubr.f32.vlgmr.msra.gmra.mrb[6].mxu1 %v4251_v30  ;;  %5572 = vmatpush3.bf16.msra.mxu0 %v5569_v5 }
 0x31a   : > { %5348 = vmatprep.mubr.f32.mxu0 %v6864_v9  ;;  %5596 = vmatpush3.bf16.msra.mxu1 %v5593_v2 }
 0x31b   : > { %5390 = vmatprep.mubr.f32.mxu1 %v6869_v24  ;;  %5574 = vmatprep.subr.bf16.mxu0 %v5573_v57 }
 0x31c   : > { %5598 = vmatprep.subr.bf16.mxu1 %v5597_v14 }
 0x320   : > { %5349 = vmatmul.mubr.f32.vlgmr.msra.gmra.mrb[6].mxu0 %v6879_v17 }
 0x321   : > { %5391 = vmatmul.mubr.f32.vlgmr.msra.gmra.mrb[6].mxu1 %v6881_v34  ;;  %5576 = vmatpush3.bf16.msra.mxu0 %v5573_v57 }
 0x322   : > { %5355 = vmatprep.mubr.f32.mxu0 %v3730_v63  ;;  %5600 = vmatpush3.bf16.msra.mxu1 %v5597_v14 }
 0x323   : > { %5397 = vmatprep.mubr.f32.mxu1 %v4238_v62  ;;  %5578 = vmatprep.subr.bf16.mxu0 %v6855_v42 }
 0x324   : > { %5602 = vmatprep.subr.bf16.mxu1 %v6857_v0 }
 0x328   : > { %5356 = vmatmul.mubr.f32.vlgmr.msra.gmra.mrb[6].mxu0 %v3740_v6 }
 0x329   : > { %5398 = vmatmul.mubr.f32.vlgmr.msra.gmra.mrb[6].mxu1 %v4248_v11  ;;  %5580 = vmatpush3.bf16.msra.mxu0 %v6855_v42 }
 0x32a   : > { %5362 = vmatprep.mubr.f32.mxu0 %v3731_v16  ;;  %5604 = vmatpush3.bf16.msra.mxu1 %v6857_v0 }
 0x32b   : > { %5404 = vmatprep.mubr.f32.mxu1 %v4239_v51  ;;  %5582 = vmatprep.subr.bf16.mxu0 %v5581_v32 }
 0x32c   : > { %5606 = vmatprep.subr.bf16.mxu1 %v5605_v36 }
 0x330   : > { %5363 = vmatmul.mubr.f32.vlgmr.msra.gmra.mrb[6].mxu0 %v3741_v26 }
 0x331   : > { %5405 = vmatmul.mubr.f32.vlgmr.msra.gmra.mrb[6].mxu1 %v4249_v25  ;;  %5584 = vmatpush3.bf16.msra.mxu0 %v5581_v32 }
 0x332   : > { %5369 = vmatprep.mubr.f32.mxu0 %v6864_v9  ;;  %5608 = vmatpush3.bf16.msra.mxu1 %v5605_v36 }
 0x333   : > { %5411 = vmatprep.mubr.f32.mxu1 %v6869_v24  ;;  %5586 = vmatprep.subr.bf16.mxu0 %v6855_v42 }
 0x334   : > { %5610 = vmatprep.subr.bf16.mxu1 %v6857_v0 }
 0x338   : > { %5370 = vmatmul.mubr.f32.vlgmr.msra.gmra.mrb[6].mxu0 %v6879_v17 }
 0x339   : > { %5412 = vmatmul.mubr.f32.vlgmr.msra.gmra.mrb[6].mxu1 %v6881_v34  ;;  %5588 = vmatpush3.bf16.msra.mxu0 %v6855_v42 }
 0x33a   : > { %5376 = vmatprep.mubr.f32.mxu0 %v6864_v9  ;;  %5612 = vmatpush3.bf16.msra.mxu1 %v6857_v0 }
 0x33b   : > { %5418 = vmatprep.mubr.f32.mxu1 %v6869_v24 }
 0x340   : > { %5377 = vmatmul.mubr.f32.vlgmr.msra.gmra.mrb[6].mxu0 %v6879_v17 }
 0x341   : > { %5419 = vmatmul.mubr.f32.vlgmr.msra.gmra.mrb[6].mxu1 %v6881_v34 }
 0x369   : > { %v2618_v39 = vpop.xlane.xlu0 %2617 }
 0x36a   : > { %5833 = vlog2.f32 %v2618_v39 }
 0x36d   : > { %v2621_v61 = vpop.xlane.xlu1 %2620  ;;  %v2624_v21 = vpop.xlane.xlu0 %2623 }
 0x36e   : > { %5835 = vlog2.f32 %v2621_v61 }
 0x371   : > { %v2627_v12 = vpop.xlane.xlu1 %2626 }
 0x372   : > { %5837 = vlog2.f32 %v2627_v12 }
 0x373   : > { %5839 = vlog2.f32 %v2624_v21 }
 0x374   : > { %v5834_v35 = vpop.eup %5833 }
 0x375   : > { %v4689_v52 = vmul.f32 0.6931472, %v5834_v35 }
 0x378   : > { %v5836_v33 = vpop.eup %5835 }
 0x379   : > { %v4691_v37 = vmul.f32 0.6931472, %v5836_v33 }
 0x37c   : > { %v5838_v56 = vpop.eup %5837 }
 0x37d   : > { %v5840_v7 = vpop.eup %5839  ;;  %v4695_v23 = vmul.f32 0.6931472, %v5838_v56 }
 0x37e   : > { %v4693_v55 = vmul.f32 0.6931472, %v5840_v7 }
 0x398   : > { %v2630_v44 = vpop.xlane.xlu0 %2629 }
 0x39b   : > { %v2633_v29 = vpop.xlane.xlu1 %2632 }
 0x39c   : > { %v2636_v63 = vpop.xlane.xlu0 %2635 }
 0x3a0   : > { %v2639_v28 = vpop.xlane.xlu1 %2638 }
 0x3e4   : > { %v5336_v8 = vpop.f32.mrb[4].mxu1 }
 0x3e5   : > { %v5294_v53 = vpop.f32.mrb[4].mxu0  ;;  %5841 = vlog2.f32 %v5336_v8  ;;  %v3646_v43 = vpop.f32.mrb[5].mxu1 }
 0x3e6   : > { %5843 = vlog2.f32 %v5294_v53  ;;  %v3138_v20 = vpop.f32.mrb[5].mxu0 }
 0x3e7   : > { %5845 = vlog2.f32 %v3138_v20 }
 0x3e8   : > { %5847 = vlog2.f32 %v3646_v43 }
 0x3e9   : > { %5849 = vlog2.f32 %v2630_v44 }
 0x3ea   : > { %5851 = vlog2.f32 %v2633_v29 }
 0x3eb   : > { %5853 = vlog2.f32 %v2636_v63 }
 0x3ec   : > { %5855 = vlog2.f32 %v2639_v28 }
 0x3ef   : > { %v5842_v41 = vpop.eup %5841 }
 0x3f0   : > { %v5844_v46 = vpop.eup %5843  ;;  %v4679_v47 = vmul.f32 0.6931472, %v5842_v41 }
 0x3f1   : > { %v5846_v40 = vpop.eup %5845  ;;  %v4675_v38 = vmul.f32 0.6931472, %v5844_v46 }
 0x3f2   : > { %v5848_v13 = vpop.eup %5847  ;;  %v4707_v42 = vsub.f32 %v4679_v47, %v4695_v23  ;;  %v4673_v0 = vmul.f32 0.6931472, %v5846_v40 }
 0x3f3   : > { %v4705_v54 = vsub.f32 %v4675_v38, %v4691_v37  ;;  %v4677_v1 = vmul.f32 0.6931472, %v5848_v13  ;;  %v5850_v18 = vpop.eup %5849 }
 0x3f4   : > { %v4715_v9 = vmax.f32 %v4707_v42, -16.118095  ;;  %v4704_v19 = vsub.f32 %v4673_v0, %v4689_v52  ;;  %v5852_v17 = vpop.eup %5851  ;;  %v4697_v15 = vmul.f32 0.6931472, %v5850_v18 }
 0x3f5   : > { %v4713_v22 = vmax.f32 %v4705_v54, -16.118095  ;;  %v4706_v24 = vsub.f32 %v4677_v1, %v4693_v55  ;;  %v5854_v16 = vpop.eup %5853  ;;  %v4699_v2 = vmul.f32 0.6931472, %v5852_v17 }
 0x3f6   : > { %4723 = vst [vmem:[%s6923_s9 + $0x18] sm:$0xff] %v4715_v9  ;;  %v4712_v27 = vmax.f32 %v4704_v19, -16.118095  ;;  %v5856_v34 = vpop.eup %5855  ;;  %v4701_v25 = vmul.f32 0.6931472, %v5854_v16 }
 0x3f7   : > { %4721 = vst [vmem:[%s6923_s9 + $0x8] sm:$0xff] %v4713_v22  ;;  %v4714_v60 = vmax.f32 %v4706_v24, -16.118095  ;;  %v4703_v31 = vmul.f32 0.6931472, %v5856_v34 }
 0x3f8   : > { %4720 = vst [vmem:[%s6923_s9] sm:$0xff] %v4712_v27 }
 0x3f9   : > { %4722 = vst [vmem:[%s6923_s9 + $0x10] sm:$0xff] %v4714_v60 }
 0x413   : > { %v5378_v4 = vpop.f32.mrb[6].mxu0 }
 0x414   : > { %5857 = vlog2.f32 %v5378_v4  ;;  %v5420_v10 = vpop.f32.mrb[6].mxu1  ;;  %v4154_v3 = vpop.f32.mrb[7].mxu0 }
 0x415   : > { %5859 = vlog2.f32 %v5420_v10  ;;  %v4662_v62 = vpop.f32.mrb[7].mxu1 }
 0x416   : > { %5861 = vlog2.f32 %v4154_v3 }
 0x417   : > { %5863 = vlog2.f32 %v4662_v62 }
 0x41e   : > { %v5858_v51 = vpop.eup %5857 }
 0x41f   : > { %v5860_v5 = vpop.eup %5859  ;;  %v4683_v59 = vmul.f32 0.6931472, %v5858_v51 }
 0x420   : > { %v5862_v6 = vpop.eup %5861  ;;  %v4687_v48 = vmul.f32 0.6931472, %v5860_v5 }
 0x421   : > { %v5864_v11 = vpop.eup %5863  ;;  %v4709_v26 = vsub.f32 %v4683_v59, %v4699_v2  ;;  %v4681_v50 = vmul.f32 0.6931472, %v5862_v6 }
 0x422   : > { %v4711_v58 = vsub.f32 %v4687_v48, %v4703_v31  ;;  %v4685_v45 = vmul.f32 0.6931472, %v5864_v11 }
 0x423   : > { %v4717_v49 = vmax.f32 %v4709_v26, -16.118095  ;;  %v4708_v30 = vsub.f32 %v4681_v50, %v4697_v15 }
 0x424   : > { %v4719_v57 = vmax.f32 %v4711_v58, -16.118095  ;;  %v4710_v14 = vsub.f32 %v4685_v45, %v4701_v25 }
 0x425   : > { %4725 = vst [vmem:[%s6923_s9 + $0x28] sm:$0xff] %v4717_v49  ;;  %v4716_v32 = vmax.f32 %v4708_v30, -16.118095 }
 0x426   : > { %4727 = vst [vmem:[%s6923_s9 + $0x38] sm:$0xff] %v4719_v57  ;;  %v4718_v36 = vmax.f32 %v4710_v14, -16.118095 }
 0x427   : > { %4724 = vst [vmem:[%s6923_s9 + $0x20] sm:$0xff] %v4716_v32 }
 0x428   : > { %4726 = vst [vmem:[%s6923_s9 + $0x30] sm:$0xff] %v4718_v36 }
 0x429   : > { %5968 = shalt.err (!%p5965_p10)
}
 0x42a   : > { %s5969_s29 = scalar_lea.hbm %s6935_s30, 1024  ;;  %s5973_s13 = scalar_lea.hbm %s6988_s4, 2048 }
 0x42b   : > { %p5970_p11 = scmp.ne.s32.totalorder %s6935_s30, %s5969_s29  ;;  %p5974_p5 = scmp.lt.u32.totalorder %s6935_s30, %s6988_s4 }
 0x42c   : > { %p5975_p2 = scmp.lt.u32.totalorder %s5973_s13, %s5969_s29  ;;  %p5977_p13 = scmp.lt.u32.totalorder %s5969_s29, %s6935_s30 }
 0x42d   : > { %p5971_p4 = pnand %p5970_p11, %p7008_p7 }
 0x42e   : > { %p5976_p1 = por %p5975_p2, %p5974_p5 }
 0x42f   : > { %p5972_p3 = pneg %p5971_p4 }
 0x430   : > { %p5978_p6 = por %p5977_p13, %p5976_p1 }
 0x432   : > { %p5979_p9 = pnand %p5978_p6, %p5972_p3 }
 0x434   : > { %5982 = shalt.err (!%p5979_p9)
}
 0x435   : > { %s6033_s26 = smov 128   ;;  %s6034_s12 = smov 8  }
 0x436   : > { %5699 = dma.vmem_to_hbm [thread:$0]  (%p7008_p7), %s6937_s8, 1024, %s6935_s30, %s4729_s0, %s6033_s26, %s6033_s26, %s6034_s12  }
 0x437 PF: > { %s4758_s9 = sand.u32 1, %s6013_s17   ;;  %p7009_p12 = scmp.ne.s32.totalorder %s6998_s28, 0 }
 0x438   : > { %p7010_p0 = scmp.ge.s32.totalorder %s6025_s20, 2  ;;  %s4759_s16 = scalar_lea.sflag [#allocation5], %s4758_s9 }
 0x43a   : > { %p5712_p8 = pnand %p7010_p0, %p7009_p12 }
 0x43c   : > { %6008 = dma.done.wait (!%p5712_p8), %s4759_s16, 1024  }
 0x43d   : > { %6010 = vsyncadd (!%p5712_p8), %s4759_s16, 4294966272  ;;  %p21_p10 = scmp.ge.s32.totalorder %s6088_s22, 4   ;;  %s7011_s17 = smov %s6017_s18 }
 0x43e   : > { %s7012_s18 = smov %s6021_s19  ;;  %s7013_s19 = smov %s6100_s25 }
 0x43f   : > { %s7014_s20 = smov %s6088_s22  ;;  %23 = sbr.rel (!%p21_p10) target bundleno = 10 (0xa), region = 105 }
 0x446   :  { %4764 = vsyncpa [#allocation4], 1 }
 0x447   :  { %4766 = vsyncpa [#allocation4 + $0x1], 1 }
 0x448   :  { %4767 = vsyncpa [#allocation7], 1 }
 0x449   :  { %4769 = vsyncpa [#allocation7 + $0x1], 1 }
 0x44a   :  { %4770 = vsyncpa [#allocation5], 1 }
 0x44b   :  { %4772 = vsyncpa [#allocation5 + $0x1], 1 }

</bundles_post_ra>
